<compile_context>
chip_gen: v7x
topology: tpu7x:2x2x1
jax: 0.10.0
libtpu: 0.0.40
codegen_flags: <defaults>
</compile_context>

<pallas_src>
import math
import functools

import jax
import jax.numpy as jnp
from jax.experimental import pallas as pl
from jax.experimental.pallas import tpu as pltpu

_F32 = 4
_BF16 = 2
_LN_EPS = 1e-5


def _layernorm(v, w, b):
    mu = jnp.mean(v, axis=-1, keepdims=True)
    var = jnp.mean((v - mu) ** 2, axis=-1, keepdims=True)
    return (v - mu) * jax.lax.rsqrt(var + _LN_EPS) * w + b


def _gelu(h, approximate):
    if approximate:
        # tanh approximation: uses the (otherwise idle) EUP slot instead of a long VALU
        # erf polynomial.  Slightly different numerics from nn.GELU() (exact).
        return jax.nn.gelu(h, approximate=True)
    return 0.5 * h * (1.0 + jax.lax.erf(h * (1.0 / math.sqrt(2.0))))


# --------------------------------------------------------------------------------------
# Kernel A: LN1 + Q/K/V projections (per sequence tile).
# --------------------------------------------------------------------------------------
def _ln_qkv_kernel(x_ref, ln1w_ref, ln1b_ref,
                   wq_ref, wk_ref, wv_ref, bq_ref, bk_ref, bv_ref,
                   q_ref, k_ref, v_ref):
    cdt = wq_ref.dtype
    ln1 = _layernorm(x_ref[0], ln1w_ref[0], ln1b_ref[0]).astype(cdt)
    # wq / bq are pre-scaled by 1/sqrt(head_dim) on the host (softmax scale folded in).
    q_ref[0] = (jnp.dot(ln1, wq_ref[...], preferred_element_type=jnp.float32)
                + bq_ref[0]).astype(q_ref.dtype)
    k_ref[0] = (jnp.dot(ln1, wk_ref[...], preferred_element_type=jnp.float32)
                + bk_ref[0]).astype(k_ref.dtype)
    v_ref[0] = (jnp.dot(ln1, wv_ref[...], preferred_element_type=jnp.float32)
                + bv_ref[0]).astype(v_ref.dtype)


# --------------------------------------------------------------------------------------
# Kernel B: flash attention with online softmax.  Grid = (batch*head, q-tile, kv-tile);
# the kv-tile axis is the innermost "arbitrary" reduction axis.
# --------------------------------------------------------------------------------------
def _flash_attn_kernel(q_ref, k_ref, v_ref, o_ref, m_sc, l_sc, acc_sc):
    ki = pl.program_id(2)

    @pl.when(ki == 0)
    def _():
        m_sc[...] = jnp.full_like(m_sc, -jnp.inf)
        l_sc[...] = jnp.zeros_like(l_sc)
        acc_sc[...] = jnp.zeros_like(acc_sc)

    q = q_ref[0]                        # (tq, dh) bf16, already scaled by 1/sqrt(dh)
    k = k_ref[0]                        # (tk, dh) bf16
    v = v_ref[0]                        # (tk, dh) bf16

    s = jax.lax.dot_general(q, k, (((1,), (1,)), ((), ())),
                            preferred_element_type=jnp.float32)        # (tq, tk) f32
    m_new = jnp.maximum(m_sc[...], jnp.max(s, axis=-1, keepdims=True))
    alpha = jnp.exp(m_sc[...] - m_new)
    p = jnp.exp(s - m_new)
    l_sc[...] = alpha * l_sc[...] + jnp.sum(p, axis=-1, keepdims=True)
    acc_sc[...] = alpha * acc_sc[...] + jnp.dot(p.astype(v.dtype), v,
                                                preferred_element_type=jnp.float32)
    m_sc[...] = m_new

    @pl.when(ki == pl.num_programs(2) - 1)
    def _():
        o_ref[0] = (acc_sc[...]
                    * pl.reciprocal(l_sc[...], approx=True)).astype(o_ref.dtype)


# --------------------------------------------------------------------------------------
# Kernel C: attention out-projection + residual + LN2 + MLP (hidden dim streamed as
# reduction tiles with an f32 accumulator) + residual.
# --------------------------------------------------------------------------------------
def _out_mlp_kernel(x_ref, ctx_ref, wo_ref, bo_ref, ln2w_ref, ln2b_ref,
                    w1_ref, b1_ref, w2_ref, b2_ref, o_ref,
                    x1_sc, ln2_sc, acc_sc, *, approximate_gelu):
    mi = pl.program_id(2)
    cdt = wo_ref.dtype

    @pl.when(mi == 0)
    def _():
        attn = jnp.dot(ctx_ref[0], wo_ref[...],
                       preferred_element_type=jnp.float32) + bo_ref[0]
        x1 = x_ref[0] + attn                                    # residual #1
        x1_sc[...] = x1
        ln2_sc[...] = _layernorm(x1, ln2w_ref[0], ln2b_ref[0]).astype(cdt)
        acc_sc[...] = jnp.zeros_like(acc_sc)

    h1 = jnp.dot(ln2_sc[...], w1_ref[...],
                 preferred_element_type=jnp.float32) + b1_ref[0]        # (ts, tm) f32
    h1 = _gelu(h1, approximate_gelu)
    acc_sc[...] += jnp.dot(h1.astype(cdt), w2_ref[...],
                           preferred_element_type=jnp.float32)

    @pl.when(mi == pl.num_programs(2) - 1)
    def _():
        o_ref[0] = (x1_sc[...] + acc_sc[...] + b2_ref[0]).astype(o_ref.dtype)  # residual #2


# --------------------------------------------------------------------------------------
# Host-side helpers.
# --------------------------------------------------------------------------------------
def _divisor_tile(n, target, multiple):
    """Largest divisor of n that is <= target and a multiple of `multiple`; falls back to
    n itself (a full-extent block is always a legal block shape)."""
    if n <= target:
        return n
    t = (target // multiple) * multiple
    while t >= multiple:
        if n % t == 0:
            return t
        t -= multiple
    return n


def _single_buffer_supported():
    """Narrow feature check for BlockSpec(pipeline_mode=pl.Buffered(1))."""
    if not hasattr(pl, "Buffered"):
        return False
    try:
        pl.BlockSpec((8, 128), lambda i: (0, 0), pipeline_mode=pl.Buffered(1))
    except (TypeError, ValueError):
        return False
    return True


def _vmem_limit_bytes(resident_estimate):
    """Generation-aware VMEM request: ceiling at ~0.75x of physical per-core VMEM (leaves
    headroom for Mosaic internal scratch); never below the 32 MiB scoped default."""
    cap = 64 << 20                       # conservative fallback = v7x per-TC VMEM
    if hasattr(pltpu, "get_tpu_info"):
        try:
            cap = int(getattr(pltpu.get_tpu_info(), "vmem_capacity_bytes", cap) or cap)
        except Exception:                # hardware query is best-effort only
            pass
    ceiling = (cap * 3) // 4
    return int(min(max(resident_estimate, 32 << 20), ceiling))


def transformer_block(x, params, num_heads, *, block_s=128, block_q=128, block_k=128,
                      block_m=128, approximate_gelu=False):
    B, S, E = x.shape
    assert E % num_heads == 0, "embed_dim must be divisible by num_heads"
    H = num_heads
    dh = E // H        # NOTE: dh < 128 underfills MXU contraction depth; model hyperparam.
    M = params["w1"].shape[0]
    cdt = jnp.bfloat16

    row = lambda a: a.reshape(1, -1).astype(jnp.float32)
    wmat = lambda w: w.T.astype(cdt)                    # (out, in) -> (in, out), bf16

    # --- host-side parameter prep -------------------------------------------------------
    wqkv, bqkv = params["wqkv"], params["bqkv"]         # (3E, E), (3E,)
    scale = 1.0 / math.sqrt(dh)
    wq = (wqkv[0:E].T * scale).astype(cdt)              # softmax scale folded into Q proj
    bq = row(bqkv[0:E] * scale)
    wk, wv = wmat(wqkv[E:2 * E]), wmat(wqkv[2 * E:3 * E])
    bk, bv = row(bqkv[E:2 * E]), row(bqkv[2 * E:3 * E])
    ln1w, ln1b = row(params["ln1_w"]), row(params["ln1_b"])
    wo, bo = wmat(params["wo"]), row(params["bo"])
    ln2w, ln2b = row(params["ln2_w"]), row(params["ln2_b"])
    w1, b1 = wmat(params["w1"]), row(params["b1"])      # (E, M), (1, M)
    w2, b2 = wmat(params["w2"]), row(params["b2"])      # (M, E), (1, E)

    ts = _divisor_tile(S, block_s, 8)
    tq = _divisor_tile(S, block_q, 8)
    tk = _divisor_tile(S, block_k, 8)
    tm = _divisor_tile(M, block_m, 128)

    single_buf = _single_buffer_supported()
    wbuf = 1 if single_buf else 2

    def invariant_spec(shape):
        idx = lambda *_, _n=len(shape): (0,) * _n
        if single_buf:
            # constant index_map across the grid -> no need to double-buffer this operand
            return pl.BlockSpec(shape, idx, pipeline_mode=pl.Buffered(1))
        return pl.BlockSpec(shape, idx)

    x_f32 = x.astype(jnp.float32)

    # --- kernel A: LN1 + QKV projections -------------------------------------------------
    proj_w = (ln1w, ln1b, wq, wk, wv, bq, bk, bv)
    est_a = (2 * ts * E * (_F32 + 3 * _BF16)                       # x in + q/k/v out blocks
             + wbuf * sum(a.size * a.dtype.itemsize for a in proj_w)
             + ts * E * (_BF16 + 3 * (_F32 + _BF16))               # ln1 + q/k/v live temps
             + (4 << 20))
    qkv_struct = jax.ShapeDtypeStruct((B, S, E), cdt)              # bf16 HBM streams
    q, k, v = pl.pallas_call(
        _ln_qkv_kernel,
        out_shape=(qkv_struct, qkv_struct, qkv_struct),
        grid_spec=pltpu.PrefetchScalarGridSpec(
            num_scalar_prefetch=0,
            grid=(B, S // ts),
            in_specs=[pl.BlockSpec((1, ts, E), lambda b, s: (b, s, 0))]
                     + [invariant_spec(tuple(a.shape)) for a in proj_w],
            out_specs=(pl.BlockSpec((1, ts, E), lambda b, s: (b, s, 0)),
                       pl.BlockSpec((1, ts, E), lambda b, s: (b, s, 0)),
                       pl.BlockSpec((1, ts, E), lambda b, s: (b, s, 0))),
        ),
        compiler_params=pltpu.CompilerParams(
            dimension_semantics=("parallel", "parallel"),
            vmem_limit_bytes=_vmem_limit_bytes(est_a),
        ),
    )(x_f32, *proj_w)

    # --- kernel B: flash attention over (batch*head, q-tile, kv-tile) --------------------
    BH = B * H
    # head relayout done once, on bf16 arrays, outside the kernel (plain XLA transpose)
    to_heads = lambda t: t.reshape(B, S, H, dh).transpose(0, 2, 1, 3).reshape(BH, S, dh)
    qh, kh, vh = to_heads(q), to_heads(k), to_heads(v)

    est_b = (2 * (2 * tq + 2 * tk) * max(dh, 128) * _BF16          # q/ctx + k/v blocks (2x)
             + 3 * tq * 128 * _F32                                 # m/l/acc scratch (padded)
             + tq * tk * (2 * _F32 + _BF16)                        # s, p(f32), p(bf16)
             + (2 << 20))
    ctx_h = pl.pallas_call(
        _flash_attn_kernel,
        out_shape=jax.ShapeDtypeStruct((BH, S, dh), cdt),
        grid_spec=pltpu.PrefetchScalarGridSpec(
            num_scalar_prefetch=0,
            grid=(BH, S // tq, S // tk),
            in_specs=[pl.BlockSpec((1, tq, dh), lambda b, i, j: (b, i, 0)),
                      pl.BlockSpec((1, tk, dh), lambda b, i, j: (b, j, 0)),
                      pl.BlockSpec((1, tk, dh), lambda b, i, j: (b, j, 0))],
            out_specs=pl.BlockSpec((1, tq, dh), lambda b, i, j: (b, i, 0)),
            scratch_shapes=[pltpu.VMEM((tq, 1), jnp.float32),      # running max
                            pltpu.VMEM((tq, 1), jnp.float32),      # running denom
                            pltpu.VMEM((tq, dh), jnp.float32)],    # output accumulator
        ),
        compiler_params=pltpu.CompilerParams(
            dimension_semantics=("parallel", "parallel", "arbitrary"),
            vmem_limit_bytes=_vmem_limit_bytes(est_b),
        ),
    )(qh, kh, vh)
    ctx = ctx_h.reshape(B, H, S, dh).transpose(0, 2, 1, 3).reshape(B, S, E)

    # --- kernel C: out-proj + residual + LN2 + MLP (M-tiled weight streaming) ------------
    inv_w = (wo, bo, ln2w, ln2b, b2)
    est_c = (2 * (ts * E * (2 * _F32 + _BF16)                      # x in, out, ctx in blocks
                  + E * tm * _BF16 + tm * _F32 + tm * E * _BF16)   # streamed w1/b1/w2 tiles
             + wbuf * sum(a.size * a.dtype.itemsize for a in inv_w)
             + ts * E * (2 * _F32 + _BF16)                         # x1 / acc / ln2 scratch
             + ts * E * _F32 + ts * tm * (_F32 + _BF16)            # attn, h1 live temps
             + (4 << 20))
    out = pl.pallas_call(
        functools.partial(_out_mlp_kernel, approximate_gelu=approximate_gelu),
        out_shape=jax.ShapeDtypeStruct((B, S, E), x.dtype),
        grid_spec=pltpu.PrefetchScalarGridSpec(
            num_scalar_prefetch=0,
            grid=(B, S // ts, M // tm),
            in_specs=[pl.BlockSpec((1, ts, E), lambda b, s, m: (b, s, 0)),   # x (residual)
                      pl.BlockSpec((1, ts, E), lambda b, s, m: (b, s, 0)),   # attention ctx
                      invariant_spec((E, E)),                                # wo
                      invariant_spec((1, E)),                                # bo
                      invariant_spec((1, E)),                                # ln2_w
                      invariant_spec((1, E)),                                # ln2_b
                      pl.BlockSpec((E, tm), lambda b, s, m: (0, m)),         # w1 tile (streamed)
                      pl.BlockSpec((1, tm), lambda b, s, m: (0, m)),         # b1 tile
                      pl.BlockSpec((tm, E), lambda b, s, m: (m, 0)),         # w2 tile (streamed)
                      invariant_spec((1, E))],                               # b2
            out_specs=pl.BlockSpec((1, ts, E), lambda b, s, m: (b, s, 0)),
            scratch_shapes=[pltpu.VMEM((ts, E), jnp.float32),                # x1 (residual)
                            pltpu.VMEM((ts, E), cdt),                        # ln2 (bf16)
                            pltpu.VMEM((ts, E), jnp.float32)],               # MLP accumulator
        ),
        compiler_params=pltpu.CompilerParams(
            dimension_semantics=("parallel", "parallel", "arbitrary"),
            vmem_limit_bytes=_vmem_limit_bytes(est_c),
        ),
    )(x_f32, ctx, wo, bo, ln2w, ln2b, w1, b1, w2, b2)

    return out


# --------------------------------------------------------------------------------------
# Pure-JAX f32 reference (HIGHEST precision) and parameter init.
# --------------------------------------------------------------------------------------
def transformer_block_ref(x, params, num_heads):
    B, S, E = x.shape
    H = num_heads
    dh = E // H
    hp = jax.lax.Precision.HIGHEST

    def ln(v, w, b):
        mu = v.mean(-1, keepdims=True)
        var = ((v - mu) ** 2).mean(-1, keepdims=True)
        return (v - mu) * jax.lax.rsqrt(var + _LN_EPS) * w + b

    ln1 = ln(x, params["ln1_w"], params["ln1_b"])
    qkv = jnp.einsum("bse,fe->bsf", ln1, params["wqkv"], precision=hp) + params["bqkv"]
    q, k, v = jnp.split(qkv, 3, axis=-1)
    heads = lambda t: t.reshape(B, S, H, dh).transpose(0, 2, 1, 3)
    qh, kh, vh = heads(q), heads(k), heads(v)
    s = jnp.einsum("bhqd,bhkd->bhqk", qh, kh, precision=hp) / math.sqrt(dh)
    p = jax.nn.softmax(s, axis=-1)
    ctx = jnp.einsum("bhqk,bhkd->bhqd", p, vh, precision=hp)
    ctx = ctx.transpose(0, 2, 1, 3).reshape(B, S, E)
    attn = jnp.einsum("bse,fe->bsf", ctx, params["wo"], precision=hp) + params["bo"]
    x1 = x + attn
    ln2 = ln(x1, params["ln2_w"], params["ln2_b"])
    h1 = jnp.einsum("bse,me->bsm", ln2, params["w1"], precision=hp) + params["b1"]
    h1 = 0.5 * h1 * (1.0 + jax.lax.erf(h1 / math.sqrt(2.0)))
    mlp = jnp.einsum("bsm,em->bse", h1, params["w2"], precision=hp) + params["b2"]
    return x1 + mlp


def init_params(key, embed_dim, mlp_dim):
    ks = jax.random.split(key, 12)

    def lin(kw, kb, out_f, in_f):
        bound = 1.0 / math.sqrt(in_f)
        w = jax.random.uniform(kw, (out_f, in_f), jnp.float32, -bound, bound)
        b = jax.random.uniform(kb, (out_f,), jnp.float32, -bound, bound)
        return w, b

    wqkv, bqkv = lin(ks[0], ks[1], 3 * embed_dim, embed_dim)   # MHA in_proj
    wo, bo = lin(ks[2], ks[3], embed_dim, embed_dim)           # MHA out_proj
    w1, b1 = lin(ks[4], ks[5], mlp_dim, embed_dim)             # MLP fc1
    w2, b2 = lin(ks[6], ks[7], embed_dim, mlp_dim)             # MLP fc2

    ln1_w = 1.0 + 0.1 * jax.random.normal(ks[8], (embed_dim,), jnp.float32)
    ln1_b = 0.1 * jax.random.normal(ks[9], (embed_dim,), jnp.float32)
    ln2_w = 1.0 + 0.1 * jax.random.normal(ks[10], (embed_dim,), jnp.float32)
    ln2_b = 0.1 * jax.random.normal(ks[11], (embed_dim,), jnp.float32)

    return dict(ln1_w=ln1_w, ln1_b=ln1_b, wqkv=wqkv, bqkv=bqkv, wo=wo, bo=bo,
                ln2_w=ln2_w, ln2_b=ln2_b, w1=w1, b1=b1, w2=w2, b2=b2)


if __name__ == "__main__":
    # Small but lane-aligned toy sizes (E, M multiples of 128; S multiple of the tile) so
    # that the flash KV loop, the q-tile axis, and the MLP M-tile accumulator all take
    # multiple grid steps.
    B, S, E, H, M = 2, 256, 128, 4, 256

    key = jax.random.PRNGKey(0)
    kx, kp = jax.random.split(key)
    x = jax.random.normal(kx, (B, S, E), jnp.float32)
    params = init_params(kp, E, M)

    out = transformer_block(x, params, num_heads=H)
    out = jax.block_until_ready(out)
    assert out.shape == (B, S, E) and out.dtype == jnp.float32

    ref = jax.block_until_ready(transformer_block_ref(x, params, num_heads=H))
    max_err = float(jnp.max(jnp.abs(out - ref)))
    assert bool(jnp.allclose(out, ref, atol=5e-2, rtol=5e-2)), f"max abs err {max_err:.4e}"

    print("KERNEL_OK")
</pallas_src>

<mosaic_0001>
module attributes {stable_mosaic.version = 11 : i64} {
  func.func @_ln_qkv_kernel(%arg0: i32, %arg1: i32, %arg2: memref<1x128x128xf32, #tpu.memory_space<vmem>>, %arg3: memref<1x128xf32, #tpu.memory_space<vmem>>, %arg4: memref<1x128xf32, #tpu.memory_space<vmem>>, %arg5: memref<128x128xbf16, #tpu.memory_space<vmem>>, %arg6: memref<128x128xbf16, #tpu.memory_space<vmem>>, %arg7: memref<128x128xbf16, #tpu.memory_space<vmem>>, %arg8: memref<1x128xf32, #tpu.memory_space<vmem>>, %arg9: memref<1x128xf32, #tpu.memory_space<vmem>>, %arg10: memref<1x128xf32, #tpu.memory_space<vmem>>, %arg11: memref<1x128x128xbf16, #tpu.memory_space<vmem>>, %arg12: memref<1x128x128xbf16, #tpu.memory_space<vmem>>, %arg13: memref<1x128x128xbf16, #tpu.memory_space<vmem>>) attributes {dimension_semantics = [#tpu.dimension_semantics<parallel>, #tpu.dimension_semantics<parallel>], iteration_bounds = array<i64: 2, 2>, scalar_prefetch = 0 : i64, scratch_operands = 0 : i64, tpu.core_type = #tpu.core_type<tc>, window_params = [{transform_indices = @transform_0, window_bounds = array<i64: 1, 128, 128>}, {pipeline_mode = #tpu.pipeline_mode<synchronous>, transform_indices = @transform_1, window_bounds = array<i64: 1, 128>}, {pipeline_mode = #tpu.pipeline_mode<synchronous>, transform_indices = @transform_2, window_bounds = array<i64: 1, 128>}, {pipeline_mode = #tpu.pipeline_mode<synchronous>, transform_indices = @transform_3, window_bounds = array<i64: 128, 128>}, {pipeline_mode = #tpu.pipeline_mode<synchronous>, transform_indices = @transform_4, window_bounds = array<i64: 128, 128>}, {pipeline_mode = #tpu.pipeline_mode<synchronous>, transform_indices = @transform_5, window_bounds = array<i64: 128, 128>}, {pipeline_mode = #tpu.pipeline_mode<synchronous>, transform_indices = @transform_6, window_bounds = array<i64: 1, 128>}, {pipeline_mode = #tpu.pipeline_mode<synchronous>, transform_indices = @transform_7, window_bounds = array<i64: 1, 128>}, {pipeline_mode = #tpu.pipeline_mode<synchronous>, transform_indices = @transform_8, window_bounds = array<i64: 1, 128>}, {transform_indices = @transform_9, window_bounds = array<i64: 1, 128, 128>}, {transform_indices = @transform_10, window_bounds = array<i64: 1, 128, 128>}, {transform_indices = @transform_11, window_bounds = array<i64: 1, 128, 128>}]} {
    %c0 = arith.constant 0 : index
    %c0_0 = arith.constant 0 : index
    %c0_1 = arith.constant 0 : index
    %0 = vector.load %arg2[%c0, %c0_0, %c0_1] : memref<1x128x128xf32, #tpu.memory_space<vmem>>, vector<1x128x128xf32>
    %1 = vector.shape_cast %0 : vector<1x128x128xf32> to vector<128x128xf32>
    %c0_2 = arith.constant 0 : index
    %c0_3 = arith.constant 0 : index
    %2 = vector.load %arg3[%c0_2, %c0_3] : memref<1x128xf32, #tpu.memory_space<vmem>>, vector<1x128xf32>
    %3 = vector.shape_cast %2 : vector<1x128xf32> to vector<128xf32>
    %c0_4 = arith.constant 0 : index
    %c0_5 = arith.constant 0 : index
    %4 = vector.load %arg4[%c0_4, %c0_5] : memref<1x128xf32, #tpu.memory_space<vmem>>, vector<1x128xf32>
    %5 = vector.shape_cast %4 : vector<1x128xf32> to vector<128xf32>
    %cst = arith.constant dense<0.000000e+00> : vector<128xf32>
    %6 = vector.multi_reduction <add>, %1, %cst [1] : vector<128x128xf32> to vector<128xf32>
    %7 = vector.shape_cast %6 : vector<128xf32> to vector<128x1xf32>
    %cst_6 = arith.constant 1.280000e+02 : f32
    %8 = vector.broadcast %cst_6 : f32 to vector<128x1xf32>
    %9 = arith.divf %7, %8 : vector<128x1xf32>
    %10 = vector.broadcast %9 : vector<128x1xf32> to vector<128x128xf32>
    %11 = arith.subf %1, %10 : vector<128x128xf32>
    %12 = arith.mulf %11, %11 : vector<128x128xf32>
    %cst_7 = arith.constant dense<0.000000e+00> : vector<128xf32>
    %13 = vector.multi_reduction <add>, %12, %cst_7 [1] : vector<128x128xf32> to vector<128xf32>
    %14 = vector.shape_cast %13 : vector<128xf32> to vector<128x1xf32>
    %cst_8 = arith.constant 1.280000e+02 : f32
    %15 = vector.broadcast %cst_8 : f32 to vector<128x1xf32>
    %16 = arith.divf %14, %15 : vector<128x1xf32>
    %17 = vector.broadcast %9 : vector<128x1xf32> to vector<128x128xf32>
    %18 = arith.subf %1, %17 : vector<128x128xf32>
    %cst_9 = arith.constant 9.99999974E-6 : f32
    %19 = vector.broadcast %cst_9 : f32 to vector<128x1xf32>
    %20 = arith.addf %16, %19 : vector<128x1xf32>
    %21 = math.rsqrt %20 : vector<128x1xf32>
    %22 = vector.broadcast %21 : vector<128x1xf32> to vector<128x128xf32>
    %23 = arith.mulf %18, %22 : vector<128x128xf32>
    %24 = vector.shape_cast %3 : vector<128xf32> to vector<1x128xf32>
    %25 = vector.broadcast %24 : vector<1x128xf32> to vector<128x128xf32>
    %26 = arith.mulf %23, %25 : vector<128x128xf32>
    %27 = vector.shape_cast %5 : vector<128xf32> to vector<1x128xf32>
    %28 = vector.broadcast %27 : vector<1x128xf32> to vector<128x128xf32>
    %29 = arith.addf %26, %28 : vector<128x128xf32>
    %30 = arith.truncf %29 : vector<128x128xf32> to vector<128x128xbf16>
    %c0_10 = arith.constant 0 : index
    %c0_11 = arith.constant 0 : index
    %31 = vector.load %arg5[%c0_10, %c0_11] : memref<128x128xbf16, #tpu.memory_space<vmem>>, vector<128x128xbf16>
    %cst_12 = arith.constant dense<0.000000e+00> : vector<128x128xf32>
    %32 = tpu.matmul %30, %31, %cst_12 {dimension_numbers = #tpu.dot_dimension_numbers<[1], [0], [0], [1], [0, 0, 1, 1], [], []>} : vector<128x128xbf16>, vector<128x128xbf16>, vector<128x128xf32> -> vector<128x128xf32>
    %c0_13 = arith.constant 0 : index
    %c0_14 = arith.constant 0 : index
    %33 = vector.load %arg8[%c0_13, %c0_14] : memref<1x128xf32, #tpu.memory_space<vmem>>, vector<1x128xf32>
    %34 = vector.shape_cast %33 : vector<1x128xf32> to vector<128xf32>
    %35 = vector.shape_cast %34 : vector<128xf32> to vector<1x128xf32>
    %36 = vector.broadcast %35 : vector<1x128xf32> to vector<128x128xf32>
    %37 = arith.addf %32, %36 : vector<128x128xf32>
    %38 = arith.truncf %37 : vector<128x128xf32> to vector<128x128xbf16>
    %c0_15 = arith.constant 0 : index
    %c0_16 = arith.constant 0 : index
    %c0_17 = arith.constant 0 : index
    %39 = vector.load %arg11[%c0_15, %c0_16, %c0_17] : memref<1x128x128xbf16, #tpu.memory_space<vmem>>, vector<1x128x128xbf16>
    %40 = vector.shape_cast %39 : vector<1x128x128xbf16> to vector<128x128xbf16>
    %41 = vector.shape_cast %38 : vector<128x128xbf16> to vector<1x128x128xbf16>
    tpu.vector_store %arg11[%c0_15, %c0_16, %c0_17], %41 {strides = array<i32>} : memref<1x128x128xbf16, #tpu.memory_space<vmem>>, vector<1x128x128xbf16>,
    %c0_18 = arith.constant 0 : index
    %c0_19 = arith.constant 0 : index
    %42 = vector.load %arg6[%c0_18, %c0_19] : memref<128x128xbf16, #tpu.memory_space<vmem>>, vector<128x128xbf16>
    %cst_20 = arith.constant dense<0.000000e+00> : vector<128x128xf32>
    %43 = tpu.matmul %30, %42, %cst_20 {dimension_numbers = #tpu.dot_dimension_numbers<[1], [0], [0], [1], [0, 0, 1, 1], [], []>} : vector<128x128xbf16>, vector<128x128xbf16>, vector<128x128xf32> -> vector<128x128xf32>
    %c0_21 = arith.constant 0 : index
    %c0_22 = arith.constant 0 : index
    %44 = vector.load %arg9[%c0_21, %c0_22] : memref<1x128xf32, #tpu.memory_space<vmem>>, vector<1x128xf32>
    %45 = vector.shape_cast %44 : vector<1x128xf32> to vector<128xf32>
    %46 = vector.shape_cast %45 : vector<128xf32> to vector<1x128xf32>
    %47 = vector.broadcast %46 : vector<1x128xf32> to vector<128x128xf32>
    %48 = arith.addf %43, %47 : vector<128x128xf32>
    %49 = arith.truncf %48 : vector<128x128xf32> to vector<128x128xbf16>
    %c0_23 = arith.constant 0 : index
    %c0_24 = arith.constant 0 : index
    %c0_25 = arith.constant 0 : index
    %50 = vector.load %arg12[%c0_23, %c0_24, %c0_25] : memref<1x128x128xbf16, #tpu.memory_space<vmem>>, vector<1x128x128xbf16>
    %51 = vector.shape_cast %50 : vector<1x128x128xbf16> to vector<128x128xbf16>
    %52 = vector.shape_cast %49 : vector<128x128xbf16> to vector<1x128x128xbf16>
    tpu.vector_store %arg12[%c0_23, %c0_24, %c0_25], %52 {strides = array<i32>} : memref<1x128x128xbf16, #tpu.memory_space<vmem>>, vector<1x128x128xbf16>,
    %c0_26 = arith.constant 0 : index
    %c0_27 = arith.constant 0 : index
    %53 = vector.load %arg7[%c0_26, %c0_27] : memref<128x128xbf16, #tpu.memory_space<vmem>>, vector<128x128xbf16>
    %cst_28 = arith.constant dense<0.000000e+00> : vector<128x128xf32>
    %54 = tpu.matmul %30, %53, %cst_28 {dimension_numbers = #tpu.dot_dimension_numbers<[1], [0], [0], [1], [0, 0, 1, 1], [], []>} : vector<128x128xbf16>, vector<128x128xbf16>, vector<128x128xf32> -> vector<128x128xf32>
    %c0_29 = arith.constant 0 : index
    %c0_30 = arith.constant 0 : index
    %55 = vector.load %arg10[%c0_29, %c0_30] : memref<1x128xf32, #tpu.memory_space<vmem>>, vector<1x128xf32>
    %56 = vector.shape_cast %55 : vector<1x128xf32> to vector<128xf32>
    %57 = vector.shape_cast %56 : vector<128xf32> to vector<1x128xf32>
    %58 = vector.broadcast %57 : vector<1x128xf32> to vector<128x128xf32>
    %59 = arith.addf %54, %58 : vector<128x128xf32>
    %60 = arith.truncf %59 : vector<128x128xf32> to vector<128x128xbf16>
    %c0_31 = arith.constant 0 : index
    %c0_32 = arith.constant 0 : index
    %c0_33 = arith.constant 0 : index
    %61 = vector.load %arg13[%c0_31, %c0_32, %c0_33] : memref<1x128x128xbf16, #tpu.memory_space<vmem>>, vector<1x128x128xbf16>
    %62 = vector.shape_cast %61 : vector<1x128x128xbf16> to vector<128x128xbf16>
    %63 = vector.shape_cast %60 : vector<128x128xbf16> to vector<1x128x128xbf16>
    tpu.vector_store %arg13[%c0_31, %c0_32, %c0_33], %63 {strides = array<i32>} : memref<1x128x128xbf16, #tpu.memory_space<vmem>>, vector<1x128x128xbf16>,
    return
  }
  func.func @transform_0(%arg0: i32, %arg1: i32) -> (i32, i32, i32) {
    %c0_i32 = arith.constant 0 : i32
    %c0_i32_0 = arith.constant 0 : i32
    return %arg0, %arg1, %c0_i32 : i32, i32, i32
  }
  func.func @transform_1(%arg0: i32, %arg1: i32) -> (i32, i32) {
    %c0_i32 = arith.constant 0 : i32
    %c0_i32_0 = arith.constant 0 : i32
    %c0_i32_1 = arith.constant 0 : i32
    return %c0_i32, %c0_i32_0 : i32, i32
  }
  func.func @transform_2(%arg0: i32, %arg1: i32) -> (i32, i32) {
    %c0_i32 = arith.constant 0 : i32
    %c0_i32_0 = arith.constant 0 : i32
    %c0_i32_1 = arith.constant 0 : i32
    return %c0_i32, %c0_i32_0 : i32, i32
  }
  func.func @transform_3(%arg0: i32, %arg1: i32) -> (i32, i32) {
    %c0_i32 = arith.constant 0 : i32
    %c0_i32_0 = arith.constant 0 : i32
    %c0_i32_1 = arith.constant 0 : i32
    return %c0_i32, %c0_i32_0 : i32, i32
  }
  func.func @transform_4(%arg0: i32, %arg1: i32) -> (i32, i32) {
    %c0_i32 = arith.constant 0 : i32
    %c0_i32_0 = arith.constant 0 : i32
    %c0_i32_1 = arith.constant 0 : i32
    return %c0_i32, %c0_i32_0 : i32, i32
  }
  func.func @transform_5(%arg0: i32, %arg1: i32) -> (i32, i32) {
    %c0_i32 = arith.constant 0 : i32
    %c0_i32_0 = arith.constant 0 : i32
    %c0_i32_1 = arith.constant 0 : i32
    return %c0_i32, %c0_i32_0 : i32, i32
  }
  func.func @transform_6(%arg0: i32, %arg1: i32) -> (i32, i32) {
    %c0_i32 = arith.constant 0 : i32
    %c0_i32_0 = arith.constant 0 : i32
    %c0_i32_1 = arith.constant 0 : i32
    return %c0_i32, %c0_i32_0 : i32, i32
  }
  func.func @transform_7(%arg0: i32, %arg1: i32) -> (i32, i32) {
    %c0_i32 = arith.constant 0 : i32
    %c0_i32_0 = arith.constant 0 : i32
    %c0_i32_1 = arith.constant 0 : i32
    return %c0_i32, %c0_i32_0 : i32, i32
  }
  func.func @transform_8(%arg0: i32, %arg1: i32) -> (i32, i32) {
    %c0_i32 = arith.constant 0 : i32
    %c0_i32_0 = arith.constant 0 : i32
    %c0_i32_1 = arith.constant 0 : i32
    return %c0_i32, %c0_i32_0 : i32, i32
  }
  func.func @transform_9(%arg0: i32, %arg1: i32) -> (i32, i32, i32) {
    %c0_i32 = arith.constant 0 : i32
    %c0_i32_0 = arith.constant 0 : i32
    return %arg0, %arg1, %c0_i32 : i32, i32, i32
  }
  func.func @transform_10(%arg0: i32, %arg1: i32) -> (i32, i32, i32) {
    %c0_i32 = arith.constant 0 : i32
    %c0_i32_0 = arith.constant 0 : i32
    return %arg0, %arg1, %c0_i32 : i32, i32, i32
  }
  func.func @transform_11(%arg0: i32, %arg1: i32) -> (i32, i32, i32) {
    %c0_i32 = arith.constant 0 : i32
    %c0_i32_0 = arith.constant 0 : i32
    return %arg0, %arg1, %c0_i32 : i32, i32, i32
  }
}

</mosaic_0001>

<bundles_post_ra>
// kernel: tpu_custom_call.1
= control target key start
LH: loop header
LB: loop body
LE: loop exit
PB: predicated region body
PF: predicated region fallthrough
CT: control target
= control target key end

     0   :  { %s3429_s0 = inlined_call_operand.hbm [shape: f32[2,256,128], index: 0, kind: input, shape index: {}]   ;;  %s3430_s1 = inlined_call_operand.vmem [shape: f32[1,128], index: 1, kind: input, shape index: {}]   ;;  %s3431_s2 = inlined_call_operand.vmem [shape: f32[1,128], index: 2, kind: input, shape index: {}]   ;;  %s3432_s3 = inlined_call_operand.hbm [shape: bf16[128,128], index: 3, kind: input, shape index: {}]   ;;  %s3433_s4 = inlined_call_operand.hbm [shape: bf16[128,128], index: 4, kind: input, shape index: {}]   ;;  %s3434_s5 = inlined_call_operand.hbm [shape: bf16[128,128], index: 5, kind: input, shape index: {}]   ;;  %s3435_s6 = inlined_call_operand.vmem [shape: f32[1,128], index: 6, kind: input, shape index: {}]   ;;  %s3436_s7 = inlined_call_operand.vmem [shape: f32[1,128], index: 7, kind: input, shape index: {}]   ;;  %s3437_s8 = inlined_call_operand.vmem [shape: f32[1,128], index: 8, kind: input, shape index: {}]   ;;  %s3438_s9 = inlined_call_operand.hbm [shape: bf16[2,256,128], index: 9, kind: output, shape index: {0}]   ;;  %s3439_s10 = inlined_call_operand.hbm [shape: bf16[2,256,128], index: 10, kind: output, shape index: {1}]   ;;  %s3440_s11 = inlined_call_operand.hbm [shape: bf16[2,256,128], index: 11, kind: output, shape index: {2}]  }
   0x1   :  { %3451 = sst [smem:[#allocation24_spill]] %s3432_s3 }
   0x2   :  { %3452 = sst [smem:[#allocation25_spill]] %s3433_s4 }
   0x3   :  { %3453 = sst [smem:[#allocation26_spill]] %s3434_s5 }
   0x4   :  { %3454 = sst [smem:[#allocation27_spill]] %s3436_s7 }
   0x5   :  { %3455 = sst [smem:[#allocation28_spill]] %s3437_s8 }
   0x6   :  { %3456 = sst [smem:[#allocation29_spill]] %s3438_s9 }
   0x7   :  { %3457 = sst [smem:[#allocation30_spill]] %s3439_s10 }
   0x8   :  { %3458 = sst [smem:[#allocation31_spill]] %s3440_s11 }
   0x9   :  { %17 = vsyncpa [#allocation3], 0 }
   0xa   :  { %19 = vsyncpa [#allocation3 + $0x1], 0 }
   0xb   :  { %20 = vsyncpa [#allocation6], 0 }
   0xc   :  { %21 = vsyncpa [#allocation9], 0 }
   0xd   :  { %22 = vsyncpa [#allocation4], 0 }
   0xe   :  { %24 = vsyncpa [#allocation4 + $0x1], 0 }
   0xf   :  { %25 = vsyncpa [#allocation12], 0 }
  0x10   :  { %27 = vsyncpa [#allocation12 + $0x1], 0  ;;  %s2728_s17 = smov 0   ;;  %s2730_s18 = smov 0  }
  0x11   :  { %s2732_s19 = smov 0   ;;  %s2734_s20 = smov 0  }
  0x12   :  { %s2736_s21 = smov 0   ;;  %s2738_s22 = smov 0  }
  0x13   :  { %s2740_s23 = smov 0   ;;  %s2742_s24 = smov 0  }
  0x14 LB: > { %3459 = sst [smem:[#allocation19_spill]] %s2625_s17  ;;  %s2769_s25 = sadd.s32 4294967295, %s2653_s24   ;;  %s2653_s24 = sphi %s2742_s24, %s33_s24   ;;  %s2649_s23 = sphi %s2740_s23, %s3500_s23   ;;  %s2645_s22 = sphi %s2738_s22, %s3499_s22   ;;  %s2641_s21 = sphi %s2736_s21, %s3498_s21   ;;  %s2637_s20 = sphi %s2734_s20, %s3497_s20   ;;  %s2633_s19 = sphi %s2732_s19, %s3496_s19   ;;  %s2629_s18 = sphi %s2730_s18, %s3495_s18   ;;  %s2625_s17 = sphi %s2728_s17, %s3494_s17  }
  0x15   : > { %3460 = sst [smem:[#allocation20_spill]] %s2637_s20  ;;  %s3441_s26 = sadd.s32 4294967294, %s2653_s24  }
  0x16   : > { %3461 = sst [smem:[#allocation21_spill]] %s2641_s21  ;;  %p67_p0 = scmp.ne.s32.totalorder %s2629_s18, %s2625_s17 }
  0x17   : > { %p3446_p1 = scmp.eq.s32.totalorder %s2769_s25, 0  ;;  %p267_p3 = scmp.eq.s32.totalorder %s3441_s26, 3 }
  0x18   : > { %p1735_p5 = scmp.ge.s32.totalorder %s2653_s24, 1  ;;  %p330_p7 = scmp.lt.s32.totalorder %s2653_s24, 5 }
  0x19   : > { %p2780_p4 = por %p3446_p1, %p67_p0  ;;  %p2785_p6 = por %p267_p3, %p67_p0 }
  0x1a   : > { %p2790_p8 = pnand %p1735_p5, %p330_p7  ;;  %s2655_s30 = smov [#allocation5]  }
  0x1b   : > { %s3462_s27 = scalar_select %p2780_p4, 1, 0 }
  0x1c   : > { %s3463_s28 = scalar_select %p2785_p6, 1, 0 }
  0x1d   : > { %s3465_s29 = scalar_select %p2790_p8, 1, 0 }
  0x1e   : > { %3464 = sst [smem:[#allocation22_spill]] %s3463_s28  ;;  %s348_s12 = sshll.u32 %s2655_s30, 4  ;;  %s2794_s12 = int_to_ptr.vmem [resolvable:$true] %s348_s12 }
  0x1f   : > { %p2212_p9 = pneg %p2790_p8  ;;  %s2656_s14 = smov [#allocation7]  }
  0x20   : > { %s361_s15 = sshll.u32 %s2656_s14, 4  ;;  %s2657_s16 = smov [#allocation8]   ;;  %s2804_s15 = int_to_ptr.vmem [resolvable:$true] %s361_s15 }
  0x21   : > { %p2800_p10 = pnand %p2212_p9, %p3446_p1  ;;  %s2806_s26 = sshll.u32 %s2657_s16, 4  ;;  %s375_s26 = int_to_ptr.vmem [resolvable:$true] %s2806_s26 }
  0x22   : > { %s3467_s3 = sld [smem:[#allocation24_spill]] }
  0x23   : > { %p2816_p12 = pneg %p2800_p10 }
  0x28   : > { %s2373_s30 = scalar_lea.hbm %s3467_s3, 1024 }
  0x29   : > { %p2374_p11 = scmp.ne.s32.totalorder %s3467_s3, %s2373_s30  ;;  %p2380_p3 = scmp.lt.u32.totalorder %s2373_s30, %s3467_s3 }
  0x2b   : > { %p2376_p13 = pnand %p2816_p12, %p2374_p11 }
  0x2d   : > { %p2377_p0 = pneg %p2376_p13 }
  0x2f   : > { %p2382_p5 = pnand %p2380_p3, %p2377_p0 }
  0x31   : > { %2385 = shalt.err (!%p2382_p5)
}
  0x32   : > { %s2386_s8 = scalar_lea.vmem %s2794_s12, 1024  ;;  %p2394_p2 = scmp.lt.s32.totalorder %s2794_s12, %s2794_s12 }
  0x33   : > { %p2387_p7 = scmp.ne.s32.totalorder %s2794_s12, %s2386_s8  ;;  %p2395_p6 = scmp.lt.s32.totalorder %s2386_s8, %s2386_s8 }
  0x35   : > { %p2389_p9 = pnand %p2387_p7, %p2816_p12  ;;  %p2396_p11 = por %p2395_p6, %p2394_p2 }
  0x37   : > { %p2390_p1 = pneg %p2389_p9 }
  0x39   : > { %p2397_p13 = pnand %p2396_p11, %p2390_p1 }
  0x3b   : > { %2400 = shalt.err (!%p2397_p13)
}
  0x3c   : > { %s2658_s11 = smov 64   ;;  %s2659_s17 = smov 4  }
  0x3d   : > { %2215 = dma.hbm_to_vmem [thread:$0]  (!%p2800_p10), %s3467_s3, 1024, %s2794_s12, [#allocation6], %s2658_s11, %s2658_s11, %s2659_s17  }
  0x3e   : > { %s3469_s4 = sld [smem:[#allocation25_spill]] }
  0x44   : > { %s2401_s8 = scalar_lea.hbm %s3469_s4, 1024 }
  0x45   : > { %p2402_p1 = scmp.ne.s32.totalorder %s3469_s4, %s2401_s8  ;;  %p2408_p0 = scmp.lt.u32.totalorder %s2401_s8, %s3469_s4 }
  0x47   : > { %p2404_p2 = pnand %p2402_p1, %p2816_p12 }
  0x49   : > { %p2405_p6 = pneg %p2404_p2 }
  0x4b   : > { %p2410_p3 = pnand %p2408_p0, %p2405_p6 }
  0x4d   : > { %2413 = shalt.err (!%p2410_p3)
}
  0x4e   : > { %s2414_s12 = scalar_lea.vmem %s2804_s15, 1024  ;;  %p2422_p11 = scmp.lt.s32.totalorder %s2804_s15, %s2804_s15 }
  0x4f   : > { %p2415_p5 = scmp.ne.s32.totalorder %s2804_s15, %s2414_s12  ;;  %p2423_p13 = scmp.lt.s32.totalorder %s2414_s12, %s2414_s12 }
  0x51   : > { %p2417_p7 = pnand %p2415_p5, %p2816_p12  ;;  %p2424_p1 = por %p2423_p13, %p2422_p11 }
  0x53   : > { %p2418_p9 = pneg %p2417_p7 }
  0x55   : > { %p2425_p2 = pnand %p2424_p1, %p2418_p9 }
  0x57   : > { %2428 = shalt.err (!%p2425_p2)
}
  0x58   : > { %2218 = dma.hbm_to_vmem [thread:$0]  (!%p2800_p10), %s3469_s4, 1024, %s2804_s15, [#allocation6], %s2658_s11, %s2658_s11, %s2659_s17  }
  0x59   : > { %s3470_s5 = sld [smem:[#allocation26_spill]] }
  0x5f   : > { %s2429_s28 = scalar_lea.hbm %s3470_s5, 1024 }
  0x60   : > { %p2430_p6 = scmp.ne.s32.totalorder %s3470_s5, %s2429_s28  ;;  %p2436_p5 = scmp.lt.u32.totalorder %s2429_s28, %s3470_s5 }
  0x62   : > { %p2432_p0 = pnand %p2430_p6, %p2816_p12 }
  0x64   : > { %p2433_p3 = pneg %p2432_p0 }
  0x66   : > { %p2438_p7 = pnand %p2436_p5, %p2433_p3 }
  0x68   : > { %2441 = shalt.err (!%p2438_p7)
}
  0x69   : > { %s2442_s12 = scalar_lea.vmem %s375_s26, 1024  ;;  %p2450_p1 = scmp.lt.s32.totalorder %s375_s26, %s375_s26 }
  0x6a   : > { %p2443_p9 = scmp.ne.s32.totalorder %s375_s26, %s2442_s12  ;;  %p2451_p2 = scmp.lt.s32.totalorder %s2442_s12, %s2442_s12 }
  0x6c   : > { %p2445_p11 = pnand %p2443_p9, %p2816_p12  ;;  %p2452_p4 = por %p2451_p2, %p2450_p1 }
  0x6e   : > { %p2446_p13 = pneg %p2445_p11 }
  0x70   : > { %p2453_p8 = pnand %p2452_p4, %p2446_p13 }
  0x72   : > { %2456 = shalt.err (!%p2453_p8)
}
  0x73   : > { %2221 = dma.hbm_to_vmem [thread:$0]  (!%p2800_p10), %s3470_s5, 1024, %s375_s26, [#allocation9], %s2658_s11, %s2658_s11, %s2659_s17  }
  0x74   : > { %s42_s9 = sadd.s32 1, %s2645_s22  ;;  %s45_s13 = sadd.s32 1, %s2649_s23 }
  0x75   : > { %p43_p4 = scmp.ge.s32.totalorder %s42_s9, 2  ;;  %s54_s10 = sadd.s32 1, %s2633_s19 }
  0x76   : > { %p61_p8 = scmp.ne.s32.totalorder %s2633_s19, %s2629_s18  ;;  %p62_p12 = scmp.eq.s32.totalorder %s2653_s24, 0 }
  0x77   : > { %s3502_s9 = smov (%p43_p4, %s42_s9), 0  ;;  %s3504_s13 = smov (!%p43_p4, %s45_s13), %s2649_s23 }
  0x78   : > { %s50_s20 = ssub.s32 %s2645_s22, %s3502_s9  ;;  %p47_p6 = scmp.ge.s32.totalorder %s3504_s13, 2 }
  0x79   : > { %p3471_p0 = scmp.eq.s32.totalorder %s2769_s25, 3  ;;  %p2905_p10 = por %p62_p12, %p61_p8 }
  0x7a   : > { %p2239_p5 = scmp.lt.s32.totalorder %s2653_s24, 4  ;;  %s3506_s13 = smov (%p47_p6, %s3504_s13), 0 }
  0x7b   : > { %p2901_p3 = por %p3471_p0, %p61_p8  ;;  %3474 = sst [smem:[#allocation23_spill]] %s3506_s13 }
  0x7c   : > { %s397_s11 = sand.u32 1, %s2633_s19   ;;  %s1741_s17 = sshll.u32 %s2645_s22, 4 }
  0x7d   : > { %s49_s28 = ssub.s32 %s2649_s23, %s3506_s13  ;;  %s1740_s14 = sshll.u32 %s397_s11, 7 }
  0x7e   : > { %s51_s30 = sor.u32 %s50_s20, %s49_s28  ;;  %s1742_s16 = sshll.u32 %s2649_s23, 5 }
  0x7f   : > { %p52_p7 = scmp.eq.s32.totalorder %s51_s30, 0  ;;  %s401_s8 = scalar_lea.vmem [#allocation2], %s1740_s14 }
  0x80   : > { %s410_s12 = sshll.u32 %s401_s8, 4  ;;  %s407_s7 = sadd.s32 %s1742_s16, %s1741_s17  ;;  %s2920_s12 = int_to_ptr.vmem [resolvable:$true] %s410_s12 }
  0x81   : > { %s2918_s15 = scalar_select %p52_p7, %s2633_s19, %s54_s10  }
  0x82   : > { %s1743_s3 = sshll.u32 %s407_s7, 7  ;;  %p2926_p9 = pnand %p2239_p5, %p2905_p10 }
  0x83   : > { %s2933_s20 = scalar_lea.hbm %s3429_s0, %s1743_s3  ;;  %s2935_s10 = scalar_lea.sflag [#allocation3], %s397_s11 }
  0x84   : > { %s2457_s17 = scalar_lea.hbm %s2933_s20, 2048  ;;  %p2459_p13 = pneg %p2926_p9 }
  0x85   : > { %p2458_p11 = scmp.ne.s32.totalorder %s2933_s20, %s2457_s17  ;;  %s2462_s13 = scalar_lea.hbm %s3429_s0, 8192 }
  0x86   : > { %p2463_p4 = scmp.lt.u32.totalorder %s2933_s20, %s3429_s0  ;;  %p2464_p8 = scmp.lt.u32.totalorder %s2462_s13, %s2457_s17 }
  0x87   : > { %p2460_p1 = pnand %p2459_p13, %p2458_p11  ;;  %p2466_p6 = scmp.lt.u32.totalorder %s2457_s17, %s2933_s20 }
  0x88   : > { %p2465_p12 = por %p2464_p8, %p2463_p4 }
  0x89   : > { %p2461_p2 = pneg %p2460_p1 }
  0x8a   : > { %p2467_p0 = por %p2466_p6, %p2465_p12 }
  0x8c   : > { %p2468_p10 = pnand %p2467_p0, %p2461_p2 }
  0x8e   : > { %2471 = shalt.err (!%p2468_p10)
}
  0x8f   : > { %s2472_s11 = scalar_lea.vmem %s2920_s12, 2048  ;;  %s2660_s30 = smov [#allocation2]  }
  0x90   : > { %p2473_p5 = scmp.ne.s32.totalorder %s2920_s12, %s2472_s11  ;;  %s2477_s14 = sshll.u32 %s2660_s30, 4  ;;  %s2478_s14 = int_to_ptr.vmem [resolvable:$false] %s2477_s14 }
  0x91   : > { %s2479_s16 = scalar_lea.vmem %s2478_s14, 4096  ;;  %p2480_p1 = scmp.lt.s32.totalorder %s2920_s12, %s2478_s14 }
  0x92   : > { %p2475_p7 = pnand %p2473_p5, %p2459_p13  ;;  %p2481_p4 = scmp.lt.s32.totalorder %s2479_s16, %s2472_s11 }
  0x94   : > { %p2476_p11 = pneg %p2475_p7  ;;  %p2482_p8 = por %p2481_p4, %p2480_p1 }
  0x96   : > { %p2483_p12 = pnand %p2482_p8, %p2476_p11 }
  0x98   : > { %2486 = shalt.err (!%p2483_p12)
}
  0x99   : > { %s2661_s8 = smov 128   ;;  %s2662_s7 = smov 8  }
  0x9a   : > { %2225 = dma.hbm_to_vmem [thread:$0]  (!%p2926_p9), %s2933_s20, 2048, %s2920_s12, %s2935_s10, %s2661_s8, %s2661_s8, %s2662_s7  }
  0x9b   : > { %p3476_p13 = scmp.ne.s32.totalorder %s3465_s29, 0 }
  0x9c   : > { %s2966_s17 = sand.u32 (!%p3476_p13), 1, %s2629_s18   ;;  %p3477_p2 = scmp.ne.s32.totalorder (!%p3476_p13), %s3462_s27, 0 }
  0x9d   : > { %422 = sbr.rel (%p3476_p13) target bundleno = 807 (0x327), region = 56  ;;  %s1745_s26 = sshll.u32 (!%p3476_p13), %s2966_s17, 7 }
  0x9e   : > { %s425_s5 = scalar_lea.sflag (!%p3476_p13), [#allocation3], %s2966_s17  ;;  %s2970_s13 = scalar_lea.vmem (!%p3476_p13), [#allocation2], %s1745_s26 }
  0xa4   : > { %2604 = dma.done.wait (%p3477_p2), %s425_s5, 2048  }
  0xa5   : > { %2606 = vsyncadd (%p3477_p2), %s425_s5, 4294965248  ;;  %p3478_p9 = scmp.eq.s32.totalorder %s2769_s25, 0 }
  0xa7   : > { %2608 = dma.done.wait (%p3478_p9), [#allocation6], 2048   ;;  %p3479_p6 = pmov %p3478_p9 }
  0xa9   : > { %2610 = vsyncadd (%p3479_p6), [#allocation6], 4294965248  ;;  %p3480_p0 = pmov %p3479_p6 }
  0xab   : > { %2612 = dma.done.wait (%p3480_p0), [#allocation9], 1024   ;;  %p3481_p10 = pmov %p3480_p0 }
  0xac   : > { %v494_v0 = vld [vmem:[%s2970_s13] sm:$0xff]  ;;  %v496_v1 = vld [vmem:[%s2970_s13 + $0x10] sm:$0xff]  ;;  %v495_v2 = vld [vmem:[%s2970_s13 + $0x8] sm:$0xff]  ;;  %s3482_s11 = sld [smem:[#allocation27_spill]]  ;;  %s3191_s30 = sshll.u32 %s2966_s17, 6 }
  0xad   : > { %2614 = vsyncadd (%p3481_p10), [#allocation9], 4294966272  ;;  %512 = vadd.xlane.f32.xlu0 %v494_v0  ;;  %516 = vadd.xlane.f32.xlu1 %v496_v1  ;;  %v497_v3 = vld [vmem:[%s2970_s13 + $0x18] sm:$0xff]  ;;  %v498_v4 = vld [vmem:[%s2970_s13 + $0x20] sm:$0xff]  ;;  %s3202_s14 = scalar_lea.vmem [#allocation10], %s3191_s30  ;;  %s3206_s16 = scalar_lea.vmem [#allocation11], %s3191_s30 }
  0xae   : > { %v499_v5 = vld [vmem:[%s2970_s13 + $0x28] sm:$0xff]  ;;  %v500_v6 = vld [vmem:[%s2970_s13 + $0x30] sm:$0xff]  ;;  %v501_v7 = vld [vmem:[%s2970_s13 + $0x38] sm:$0xff]  ;;  %s3483_s8 = sld [smem:[#allocation20_spill]]  ;;  %s3484_s7 = sld [smem:[#allocation21_spill]] }
  0xaf   : > { %v2993_v8 = vld [vmem:[%s2970_s13 + $0x40] sm:$0xff]  ;;  %v2996_v9 = vld [vmem:[%s2970_s13 + $0x48] sm:$0xff]  ;;  %v2999_v10 = vld [vmem:[%s2970_s13 + $0x50] sm:$0xff]  ;;  %s1511_s4 = sshll.u32 %s3202_s14, 4  ;;  %s1529_s27 = sshll.u32 %s3206_s16, 4  ;;  %s3246_s4 = int_to_ptr.vmem [resolvable:$true] %s1511_s4  ;;  %s3248_s27 = int_to_ptr.vmem [resolvable:$true] %s1529_s27 }
  0xb0   : > { %v3002_v11 = vld [vmem:[%s2970_s13 + $0x58] sm:$0xff]  ;;  %v3009_v12 = vld [vmem:[%s2970_s13 + $0x60] sm:$0xff]  ;;  %v3012_v13 = vld [vmem:[%s2970_s13 + $0x68] sm:$0xff]  ;;  %s1490_s29 = sand.u32 1, %s2769_s25   ;;  %s3485_s10 = sld [smem:[#allocation30_spill]] }
  0xb1   : > { %514 = vadd.xlane.f32.xlu0 %v495_v2  ;;  %518 = vadd.xlane.f32.xlu1 %v497_v3  ;;  %v3017_v14 = vld [vmem:[%s2970_s13 + $0x70] sm:$0xff]  ;;  %v3020_v15 = vld [vmem:[%s2970_s13 + $0x78] sm:$0xff]  ;;  %v2317_v16 = vld [vmem:[#allocation5] sm:$0xff]   ;;  %s3281_s25 = scalar_lea.sflag [#allocation12], %s1490_s29  ;;  %s2487_s20 = scalar_lea.vmem %s3248_s27, 1024 }
  0xb2   : > { %v2318_v17 = vld [vmem:[#allocation7] sm:$0xff]   ;;  %2080 = vmatprep.subr.bf16.mxu0 %v2317_v16  ;;  %v2319_v61 = vld [vmem:[#allocation5 + $0x8] sm:$0xff]   ;;  %p2488_p5 = scmp.ne.s32.totalorder %s3248_s27, %s2487_s20 }
  0xb3   : > { %2112 = vmatprep.subr.bf16.mxu1 %v2318_v17  ;;  %2081 = vmatpush3.bf16.msra.mxu0 %v2317_v16  ;;  %v2320_v62 = vld [vmem:[#allocation7 + $0x8] sm:$0xff]  }
  0xb4   : > { %2113 = vmatpush3.bf16.msra.mxu1 %v2318_v17  ;;  %2082 = vmatprep.subr.bf16.mxu0 %v2319_v61  ;;  %s1832_s26 = sshll.u32 %s3483_s8, 4  ;;  %s1833_s5 = sshll.u32 %s3484_s7, 5 }
  0xb5   : > { %520 = vadd.xlane.f32.xlu0 %v498_v4  ;;  %522 = vadd.xlane.f32.xlu1 %v499_v5  ;;  %s1508_s13 = sadd.s32 %s1833_s5, %s1832_s26  ;;  %s3486_s8 = sld [smem:[#allocation29_spill]] }
  0xb6   : > { %2114 = vmatprep.subr.bf16.mxu1 %v2320_v62  ;;  %s3244_s12 = sshll.u32 %s1508_s13, 6  ;;  %s3487_s13 = sld [smem:[#allocation28_spill]] }
  0xb7   : > { %2083 = vmatpush3.bf16.msra.mxu0 %v2319_v61  ;;  %s3258_s3 = scalar_lea.hbm %s3485_s10, %s3244_s12  ;;  %p2489_p7 = pnand %p2488_p5, %p2901_p3 }
  0xb8   : > { %2115 = vmatpush3.bf16.msra.mxu1 %v2320_v62 }
  0xb9   : > { %524 = vadd.xlane.f32.xlu0 %v500_v6  ;;  %526 = vadd.xlane.f32.xlu1 %v501_v7  ;;  %p2490_p11 = pneg %p2489_p7 }
  0xbb   : > { %s3266_s7 = scalar_lea.hbm %s3486_s8, %s3244_s12 }
  0xbd   : > { %528 = vadd.xlane.f32.xlu0 %v2993_v8  ;;  %530 = vadd.xlane.f32.xlu1 %v2996_v9 }
  0xc1   : > { %532 = vadd.xlane.f32.xlu0 %v2999_v10  ;;  %534 = vadd.xlane.f32.xlu1 %v3002_v11 }
  0xc5   : > { %536 = vadd.xlane.f32.xlu0 %v3009_v12  ;;  %538 = vadd.xlane.f32.xlu1 %v3012_v13 }
  0xc9   : > { %540 = vadd.xlane.f32.xlu0 %v3017_v14  ;;  %542 = vadd.xlane.f32.xlu1 %v3020_v15 }
 0x13a   : > { %v513_v18 = vpop.xlane.xlu0 %512  ;;  %v517_v19 = vpop.xlane.xlu1 %516 }
 0x13b   : > { %v545_v20 = vmul.f32 0.0078125, %v513_v18  ;;  %v547_v21 = vmul.f32 0.0078125, %v517_v19 }
 0x13d   : > { %v3024_v22 = vsub.f32 %v494_v0, %v545_v20  ;;  %v3026_v23 = vsub.f32 %v496_v1, %v547_v21 }
 0x13e   : > { %v515_v24 = vpop.xlane.xlu0 %514  ;;  %v519_v25 = vpop.xlane.xlu1 %518 }
 0x13f   : > { %v546_v26 = vmul.f32 0.0078125, %v515_v24  ;;  %v577_v27 = vmul.f32 %v3024_v22, %v3024_v22  ;;  %v548_v28 = vmul.f32 0.0078125, %v519_v25  ;;  %v579_v31 = vmul.f32 %v3026_v23, %v3026_v23  ;;  %v2323_v24 = vld [vmem:[#allocation5 + $0x18] sm:$0xff]  }
 0x140   : > { %v2324_v25 = vld [vmem:[#allocation7 + $0x18] sm:$0xff]  }
 0x141   : > { %v3030_v29 = vsub.f32 %v495_v2, %v546_v26  ;;  %593 = vadd.xlane.f32.xlu0 %v577_v27  ;;  %v3032_v30 = vsub.f32 %v497_v3, %v548_v28  ;;  %v2325_v27 = vld [vmem:[#allocation5 + $0x20] sm:$0xff]   ;;  %v2327_v28 = vld [vmem:[#allocation5 + $0x28] sm:$0xff]  }
 0x142   : > { %v521_v32 = vpop.xlane.xlu0 %520  ;;  %v523_v33 = vpop.xlane.xlu1 %522 }
 0x143   : > { %v549_v34 = vmul.f32 0.0078125, %v521_v32  ;;  %v578_v35 = vmul.f32 %v3030_v29, %v3030_v29  ;;  %v550_v36 = vmul.f32 0.0078125, %v523_v33  ;;  %v580_v39 = vmul.f32 %v3032_v30, %v3032_v30  ;;  %v2329_v32 = vld [vmem:[#allocation5 + $0x30] sm:$0xff]  }
 0x144   : > { %v2330_v33 = vld [vmem:[#allocation7 + $0x30] sm:$0xff]  }
 0x145   : > { %v3038_v37 = vsub.f32 %v498_v4, %v549_v34  ;;  %597 = vadd.xlane.f32.xlu0 %v579_v31  ;;  %595 = vadd.xlane.f32.xlu1 %v578_v35  ;;  %v3040_v38 = vsub.f32 %v499_v5, %v550_v36  ;;  %v2328_v31 = vld [vmem:[#allocation7 + $0x28] sm:$0xff]   ;;  %v2331_v34 = vld [vmem:[#allocation5 + $0x38] sm:$0xff]   ;;  %v3096_v36 = vld [vmem:[#allocation8] sm:$0xff]  }
 0x146   : > { %v525_v40 = vpop.xlane.xlu0 %524  ;;  %v527_v41 = vpop.xlane.xlu1 %526  ;;  %v2332_v35 = vld [vmem:[#allocation7 + $0x38] sm:$0xff]  }
 0x147   : > { %v551_v42 = vmul.f32 0.0078125, %v525_v40  ;;  %v581_v43 = vmul.f32 %v3038_v37, %v3038_v37  ;;  %v552_v44 = vmul.f32 0.0078125, %v527_v41  ;;  %v582_v47 = vmul.f32 %v3040_v38, %v3040_v38 }
 0x149   : > { %v3046_v45 = vsub.f32 %v500_v6, %v551_v42  ;;  %599 = vadd.xlane.f32.xlu1 %v580_v39  ;;  %601 = vadd.xlane.f32.xlu0 %v581_v43  ;;  %v3048_v46 = vsub.f32 %v501_v7, %v552_v44 }
 0x14a   : > { %v529_v48 = vpop.xlane.xlu0 %528  ;;  %v531_v49 = vpop.xlane.xlu1 %530 }
 0x14b   : > { %v553_v50 = vmul.f32 0.0078125, %v529_v48  ;;  %v583_v51 = vmul.f32 %v3046_v45, %v3046_v45  ;;  %v554_v52 = vmul.f32 0.0078125, %v531_v49  ;;  %v584_v55 = vmul.f32 %v3048_v46, %v3048_v46 }
 0x14d   : > { %v3055_v53 = vsub.f32 %v2993_v8, %v553_v50  ;;  %603 = vadd.xlane.f32.xlu1 %v582_v47  ;;  %605 = vadd.xlane.f32.xlu0 %v583_v51  ;;  %v3058_v54 = vsub.f32 %v2996_v9, %v554_v52 }
 0x14e   : > { %v533_v56 = vpop.xlane.xlu0 %532  ;;  %v535_v57 = vpop.xlane.xlu1 %534 }
 0x14f   : > { %v555_v58 = vmul.f32 0.0078125, %v533_v56  ;;  %v585_v59 = vmul.f32 %v3055_v53, %v3055_v53  ;;  %v556_v60 = vmul.f32 0.0078125, %v535_v57  ;;  %v586_v1 = vmul.f32 %v3058_v54, %v3058_v54 }
 0x151   : > { %v3065_v63 = vsub.f32 %v2999_v10, %v555_v58  ;;  %607 = vadd.xlane.f32.xlu1 %v584_v55  ;;  %609 = vadd.xlane.f32.xlu0 %v585_v59  ;;  %v3068_v0 = vsub.f32 %v3002_v11, %v556_v60  ;;  %v2321_v10 = vld [vmem:[#allocation5 + $0x10] sm:$0xff]  }
 0x152   : > { %v537_v2 = vpop.xlane.xlu0 %536  ;;  %v539_v3 = vpop.xlane.xlu1 %538  ;;  %v2322_v11 = vld [vmem:[#allocation7 + $0x10] sm:$0xff]   ;;  %2084 = vmatprep.subr.bf16.mxu0 %v2321_v10 }
 0x153   : > { %v557_v4 = vmul.f32 0.0078125, %v537_v2  ;;  %v587_v5 = vmul.f32 %v3065_v63, %v3065_v63  ;;  %v558_v6 = vmul.f32 0.0078125, %v539_v3  ;;  %v588_v9 = vmul.f32 %v3068_v0, %v3068_v0  ;;  %2116 = vmatprep.subr.bf16.mxu1 %v2322_v11  ;;  %2085 = vmatpush3.bf16.msra.mxu0 %v2321_v10  ;;  %v3104_v10 = vld [vmem:[%s3430_s1] ss:$0 sm:$0xff] }
 0x154   : > { %2117 = vmatpush3.bf16.msra.mxu1 %v2322_v11  ;;  %2086 = vmatprep.subr.bf16.mxu0 %v2323_v24 }
 0x155   : > { %v3075_v7 = vsub.f32 %v3009_v12, %v557_v4  ;;  %611 = vadd.xlane.f32.xlu1 %v586_v1  ;;  %613 = vadd.xlane.f32.xlu0 %v587_v5  ;;  %v3078_v8 = vsub.f32 %v3012_v13, %v558_v6 }
 0x156   : > { %v541_v16 = vpop.xlane.xlu0 %540  ;;  %v543_v17 = vpop.xlane.xlu1 %542  ;;  %2118 = vmatprep.subr.bf16.mxu1 %v2324_v25 }
 0x157   : > { %v559_v18 = vmul.f32 0.0078125, %v541_v16  ;;  %v589_v19 = vmul.f32 %v3075_v7, %v3075_v7  ;;  %v560_v20 = vmul.f32 0.0078125, %v543_v17  ;;  %v590_v21 = vmul.f32 %v3078_v8, %v3078_v8  ;;  %2087 = vmatpush3.bf16.msra.mxu0 %v2323_v24 }
 0x158   : > { %2119 = vmatpush3.bf16.msra.mxu1 %v2324_v25  ;;  %2088 = vmatprep.subr.bf16.mxu0 %v2325_v27 }
 0x159   : > { %v3085_v12 = vsub.f32 %v3017_v14, %v559_v18  ;;  %615 = vadd.xlane.f32.xlu1 %v588_v9  ;;  %617 = vadd.xlane.f32.xlu0 %v589_v19  ;;  %v3088_v13 = vsub.f32 %v3020_v15, %v560_v20  ;;  %v2326_v15 = vld [vmem:[#allocation7 + $0x20] sm:$0xff]  }
 0x15a   : > { %2120 = vmatprep.subr.bf16.mxu1 %v2326_v15 }
 0x15b   : > { %v591_v26 = vmul.f32 %v3085_v12, %v3085_v12  ;;  %v592_v14 = vmul.f32 %v3088_v13, %v3088_v13  ;;  %2089 = vmatpush3.bf16.msra.mxu0 %v2325_v27 }
 0x15c   : > { %2121 = vmatpush3.bf16.msra.mxu1 %v2326_v15  ;;  %2090 = vmatprep.subr.bf16.mxu0 %v2327_v28 }
 0x15d   : > { %619 = vadd.xlane.f32.xlu1 %v590_v21  ;;  %621 = vadd.xlane.f32.xlu0 %v591_v26  ;;  %v3111_v26 = vld [vmem:[%s3431_s2] ss:$0 sm:$0xff] }
 0x15e   : > { %2122 = vmatprep.subr.bf16.mxu1 %v2328_v31 }
 0x15f   : > { %2091 = vmatpush3.bf16.msra.mxu0 %v2327_v28 }
 0x160   : > { %2123 = vmatpush3.bf16.msra.mxu1 %v2328_v31  ;;  %2092 = vmatprep.subr.bf16.mxu0 %v2329_v32 }
 0x161   : > { %623 = vadd.xlane.f32.xlu1 %v592_v14  ;;  %2124 = vmatprep.subr.bf16.mxu1 %v2330_v33 }
 0x163   : > { %2093 = vmatpush3.bf16.msra.mxu0 %v2329_v32 }
 0x164   : > { %2125 = vmatpush3.bf16.msra.mxu1 %v2330_v33  ;;  %2094 = vmatprep.subr.bf16.mxu0 %v2331_v34 }
 0x165   : > { %2126 = vmatprep.subr.bf16.mxu1 %v2332_v35 }
 0x167   : > { %2095 = vmatpush3.bf16.msra.mxu0 %v2331_v34 }
 0x168   : > { %2127 = vmatpush3.bf16.msra.mxu1 %v2332_v35  ;;  %2144 = vmatprep.subr.bf16.mxu0 %v3096_v36 }
 0x169   : > { %2176 = vmatprep.subr.bf16.mxu1 %v3096_v36 }
 0x1ce   : > { %v594_v39 = vpop.xlane.xlu0 %593 }
 0x1cf   : > { %v625_v40 = vmul.f32 0.0078125, %v594_v39 }
 0x1d1   : > { %v641_v41 = vadd.f32 1e-05, %v625_v40 }
 0x1d2   : > { %v596_v42 = vpop.xlane.xlu1 %595  ;;  %v598_v43 = vpop.xlane.xlu0 %597 }
 0x1d3   : > { %2341 = vrsqrt.f32 %v641_v41  ;;  %v626_v44 = vmul.f32 0.0078125, %v596_v42  ;;  %v627_v47 = vmul.f32 0.0078125, %v598_v43 }
 0x1d5   : > { %v642_v48 = vadd.f32 1e-05, %v626_v44  ;;  %v643_v49 = vadd.f32 1e-05, %v627_v47 }
 0x1d6   : > { %v600_v50 = vpop.xlane.xlu1 %599  ;;  %v602_v51 = vpop.xlane.xlu0 %601 }
 0x1d7   : > { %2343 = vrsqrt.f32 %v642_v48  ;;  %v628_v52 = vmul.f32 0.0078125, %v600_v50  ;;  %v629_v55 = vmul.f32 0.0078125, %v602_v51 }
 0x1d8   : > { %2345 = vrsqrt.f32 %v643_v49 }
 0x1d9   : > { %v644_v56 = vadd.f32 1e-05, %v628_v52  ;;  %v645_v57 = vadd.f32 1e-05, %v629_v55 }
 0x1da   : > { %v604_v58 = vpop.xlane.xlu1 %603  ;;  %v606_v59 = vpop.xlane.xlu0 %605 }
 0x1db   : > { %2347 = vrsqrt.f32 %v644_v56  ;;  %v630_v60 = vmul.f32 0.0078125, %v604_v58  ;;  %v631_v61 = vmul.f32 0.0078125, %v606_v59 }
 0x1dc   : > { %2349 = vrsqrt.f32 %v645_v57 }
 0x1dd   : > { %v2342_v62 = vpop.eup %2341  ;;  %v646_v1 = vadd.f32 1e-05, %v630_v60  ;;  %v647_v2 = vadd.f32 1e-05, %v631_v61  ;;  %v2334_v61 = vld [vmem:[#allocation8 + $0x8] sm:$0xff]  }
 0x1de   : > { %v608_v3 = vpop.xlane.xlu1 %607  ;;  %v610_v4 = vpop.xlane.xlu0 %609  ;;  %v673_v5 = vmul.f32 %v2342_v62, %v3024_v22 }
 0x1df   : > { %2351 = vrsqrt.f32 %v646_v1  ;;  %v632_v6 = vmul.f32 0.0078125, %v608_v3  ;;  %v633_v9 = vmul.f32 0.0078125, %v610_v4 }
 0x1e0   : > { %2353 = vrsqrt.f32 %v647_v2  ;;  %v695_v24 = vmul.f32 %v3104_v10, %v673_v5 }
 0x1e1   : > { %v2344_v11 = vpop.eup %2343  ;;  %v648_v16 = vadd.f32 1e-05, %v632_v6  ;;  %v649_v17 = vadd.f32 1e-05, %v633_v9 }
 0x1e2   : > { %v2346_v18 = vpop.eup %2345  ;;  %v612_v19 = vpop.xlane.xlu1 %611  ;;  %v674_v21 = vmul.f32 %v2344_v11, %v3030_v29  ;;  %v717_v35 = vadd.f32 %v3111_v26, %v695_v24 }
 0x1e3   : > { %v614_v20 = vpop.xlane.xlu0 %613  ;;  %2355 = vrsqrt.f32 %v648_v16  ;;  %v634_v22 = vmul.f32 0.0078125, %v612_v19  ;;  %v675_v14 = vmul.f32 %v2346_v18, %v3026_v23  ;;  %v2335_v18 = vld [vmem:[#allocation8 + $0x10] sm:$0xff]  }
 0x1e4   : > { %v635_v25 = vmul.f32 0.0078125, %v614_v20  ;;  %2357 = vrsqrt.f32 %v649_v17  ;;  %v696_v27 = vmul.f32 %v3104_v10, %v674_v21 }
 0x1e5   : > { %v2348_v15 = vpop.eup %2347  ;;  %v650_v28 = vadd.f32 1e-05, %v634_v22  ;;  %v697_v29 = vmul.f32 %v3104_v10, %v675_v14 }
 0x1e6   : > { %v651_v31 = vadd.f32 1e-05, %v635_v25  ;;  %v2350_v32 = vpop.eup %2349  ;;  %v616_v33 = vpop.xlane.xlu1 %615  ;;  %v718_v39 = vadd.f32 %v3111_v26, %v696_v27  ;;  %v676_v40 = vmul.f32 %v2348_v15, %v3032_v30  ;;  %v2336_v27 = vld [vmem:[#allocation8 + $0x18] sm:$0xff]  }
 0x1e7   : > { %v618_v34 = vpop.xlane.xlu0 %617  ;;  %2359 = vrsqrt.f32 %v650_v28  ;;  %v636_v41 = vmul.f32 0.0078125, %v616_v33  ;;  %v677_v44 = vmul.f32 %v2350_v32, %v3038_v37  ;;  %v719_v50 = vadd.f32 %v3111_v26, %v697_v29 }
 0x1e8   : > { %v637_v23 = vmul.f32 0.0078125, %v618_v34  ;;  %2361 = vrsqrt.f32 %v651_v31  ;;  %v3119_v42 = vpack.c.bf16 %v718_v39, %v717_v35  ;;  %v698_v43 = vmul.f32 %v3104_v10, %v676_v40  ;;  %v2337_v35 = vld [vmem:[#allocation8 + $0x20] sm:$0xff]  }
 0x1e9   : > { %v2352_v47 = vpop.eup %2351  ;;  %v652_v48 = vadd.f32 1e-05, %v636_v41  ;;  %v699_v57 = vmul.f32 %v3104_v10, %v677_v44 }
 0x1ea   : > { %v653_v49 = vadd.f32 1e-05, %v637_v23  ;;  %v2354_v51 = vpop.eup %2353  ;;  %v620_v52 = vpop.xlane.xlu1 %619  ;;  %2096 = vmatprep.mubr.bf16.mxu0 %v3119_v42  ;;  %2128 = vmatprep.mubr.bf16.mxu1 %v3119_v42  ;;  %v720_v55 = vadd.f32 %v3111_v26, %v698_v43  ;;  %v678_v56 = vmul.f32 %v2352_v47, %v3040_v38 }
 0x1eb   : > { %v622_v30 = vpop.xlane.xlu0 %621  ;;  %2363 = vrsqrt.f32 %v652_v48  ;;  %v638_v37 = vmul.f32 0.0078125, %v620_v52  ;;  %v679_v59 = vmul.f32 %v2354_v51, %v3046_v45  ;;  %v721_v4 = vadd.f32 %v3111_v26, %v699_v57  ;;  %v2338_v48 = vld [vmem:[#allocation8 + $0x28] sm:$0xff]  }
 0x1ec   : > { %v639_v58 = vmul.f32 0.0078125, %v622_v30  ;;  %2365 = vrsqrt.f32 %v653_v49  ;;  %v3130_v60 = vpack.c.bf16 %v720_v55, %v719_v50  ;;  %v700_v62 = vmul.f32 %v3104_v10, %v678_v56  ;;  %v2339_v55 = vld [vmem:[#allocation8 + $0x30] sm:$0xff]  }
 0x1ed   : > { %v2356_v1 = vpop.eup %2355  ;;  %v654_v2 = vadd.f32 1e-05, %v638_v37  ;;  %v701_v9 = vmul.f32 %v3104_v10, %v679_v59  ;;  %v3188_v59 = vld [vmem:[%s3482_s11] ss:$0 sm:$0xff] }
 0x1ee   : > { %v655_v3 = vadd.f32 1e-05, %v639_v58  ;;  %v2358_v5 = vpop.eup %2357  ;;  %v624_v38 = vpop.xlane.xlu1 %623  ;;  %2097 = vmatmul.mubr.bf16.vlgmr.msra.gmra.mrb[0].mxu0 %v3130_v60  ;;  %2129 = vmatmul.mubr.bf16.vlgmr.msra.gmra.mrb[0].mxu1 %v3130_v60  ;;  %v722_v6 = vadd.f32 %v3111_v26, %v700_v62  ;;  %v680_v45 = vmul.f32 %v2356_v1, %v3048_v46  ;;  %v2340_v58 = vld [vmem:[#allocation8 + $0x38] sm:$0xff]  }
 0x1ef   : > { %2367 = vrsqrt.f32 %v654_v2  ;;  %v640_v11 = vmul.f32 0.0078125, %v624_v38  ;;  %2145 = vmatpush3.bf16.msra.mxu0 %v3096_v36  ;;  %2184 = vmatpush3.bf16.msra.mxu1 %v3096_v36  ;;  %v681_v16 = vmul.f32 %v2358_v5, %v3055_v53  ;;  %v723_v36 = vadd.f32 %v3111_v26, %v701_v9 }
 0x1f0   : > { %2369 = vrsqrt.f32 %v655_v3  ;;  %2146 = vmatprep.subr.bf16.mxu0 %v2334_v61  ;;  %2177 = vmatprep.subr.bf16.mxu1 %v2334_v61  ;;  %v3142_v17 = vpack.c.bf16 %v722_v6, %v721_v4  ;;  %v702_v19 = vmul.f32 %v3104_v10, %v680_v45 }
 0x1f1   : > { %v2360_v20 = vpop.eup %2359  ;;  %v656_v46 = vadd.f32 1e-05, %v640_v11  ;;  %v703_v21 = vmul.f32 %v3104_v10, %v681_v16 }
 0x1f2   : > { %v2362_v24 = vpop.eup %2361  ;;  %2100 = vmatprep.mubr.bf16.mxu0 %v3142_v17  ;;  %2132 = vmatprep.mubr.bf16.mxu1 %v3142_v17  ;;  %v724_v53 = vadd.f32 %v3111_v26, %v702_v19  ;;  %v682_v22 = vmul.f32 %v2360_v20, %v3058_v54 }
 0x1f3   : > { %2371 = vrsqrt.f32 %v656_v46  ;;  %2147 = vmatpush3.bf16.msra.mxu0 %v2334_v61  ;;  %2185 = vmatpush3.bf16.msra.mxu1 %v2334_v61  ;;  %v683_v25 = vmul.f32 %v2362_v24, %v3065_v63  ;;  %v725_v31 = vadd.f32 %v3111_v26, %v703_v21 }
 0x1f4   : > { %2148 = vmatprep.subr.bf16.mxu0 %v2335_v18  ;;  %2178 = vmatprep.subr.bf16.mxu1 %v2335_v18  ;;  %v3152_v14 = vpack.c.bf16 %v724_v53, %v723_v36  ;;  %v704_v15 = vmul.f32 %v3104_v10, %v682_v22 }
 0x1f5   : > { %v2364_v28 = vpop.eup %2363  ;;  %v705_v63 = vmul.f32 %v3104_v10, %v683_v25 }
 0x1f6   : > { %v2366_v29 = vpop.eup %2365  ;;  %2101 = vmatmul.mubr.bf16.gmra.mrb[4].mxu0 %v3152_v14  ;;  %2133 = vmatmul.mubr.bf16.gmra.mrb[4].mxu1 %v3152_v14  ;;  %v726_v54 = vadd.f32 %v3111_v26, %v704_v15  ;;  %v684_v32 = vmul.f32 %v2364_v28, %v3068_v0 }
 0x1f7   : > { %2149 = vmatpush3.bf16.msra.mxu0 %v2335_v18  ;;  %2186 = vmatpush3.bf16.msra.mxu1 %v2335_v18  ;;  %v685_v33 = vmul.f32 %v2366_v29, %v3075_v7  ;;  %v727_v0 = vadd.f32 %v3111_v26, %v705_v63 }
 0x1f8   : > { %2150 = vmatprep.subr.bf16.mxu0 %v2336_v27  ;;  %2179 = vmatprep.subr.bf16.mxu1 %v2336_v27  ;;  %v737_v34 = vpack.c.bf16 %v726_v54, %v725_v31  ;;  %v706_v39 = vmul.f32 %v3104_v10, %v684_v32 }
 0x1f9   : > { %v2368_v40 = vpop.eup %2367  ;;  %v707_v41 = vmul.f32 %v3104_v10, %v685_v33 }
 0x1fa   : > { %v2370_v23 = vpop.eup %2369  ;;  %2104 = vmatprep.mubr.bf16.mxu0 %v737_v34  ;;  %2136 = vmatprep.mubr.bf16.mxu1 %v737_v34  ;;  %v728_v43 = vadd.f32 %v3111_v26, %v706_v39  ;;  %v686_v44 = vmul.f32 %v2368_v40, %v3078_v8 }
 0x1fb   : > { %2151 = vmatpush3.bf16.msra.mxu0 %v2336_v27  ;;  %2187 = vmatpush3.bf16.msra.mxu1 %v2336_v27  ;;  %v687_v7 = vmul.f32 %v2370_v23, %v3085_v12  ;;  %v729_v51 = vadd.f32 %v3111_v26, %v707_v41 }
 0x1fc   : > { %2152 = vmatprep.subr.bf16.mxu0 %v2337_v35  ;;  %2180 = vmatprep.subr.bf16.mxu1 %v2337_v35  ;;  %v738_v47 = vpack.c.bf16 %v728_v43, %v727_v0  ;;  %v708_v49 = vmul.f32 %v3104_v10, %v686_v44 }
 0x1fd   : > { %v2372_v50 = vpop.eup %2371  ;;  %v709_v8 = vmul.f32 %v3104_v10, %v687_v7 }
 0x1fe   : > { %2105 = vmatmul.mubr.bf16.gmra.mrb[8].mxu0 %v738_v47  ;;  %2137 = vmatmul.mubr.bf16.gmra.mrb[8].mxu1 %v738_v47  ;;  %v730_v52 = vadd.f32 %v3111_v26, %v708_v49  ;;  %v688_v30 = vmul.f32 %v2372_v50, %v3088_v13 }
 0x1ff   : > { %2153 = vmatpush3.bf16.msra.mxu0 %v2337_v35  ;;  %2188 = vmatpush3.bf16.msra.mxu1 %v2337_v35  ;;  %v731_v57 = vadd.f32 %v3111_v26, %v709_v8 }
 0x200   : > { %2154 = vmatprep.subr.bf16.mxu0 %v2338_v48  ;;  %2181 = vmatprep.subr.bf16.mxu1 %v2338_v48  ;;  %v739_v12 = vpack.c.bf16 %v730_v52, %v729_v51  ;;  %v710_v56 = vmul.f32 %v3104_v10, %v688_v30 }
 0x202   : > { %2108 = vmatprep.mubr.bf16.mxu0 %v739_v12  ;;  %2140 = vmatprep.mubr.bf16.mxu1 %v739_v12  ;;  %v732_v37 = vadd.f32 %v3111_v26, %v710_v56  ;;  %v3183_v26 = vld [vmem:[%s3435_s6] ss:$0 sm:$0xff] }
 0x203   : > { %2155 = vmatpush3.bf16.msra.mxu0 %v2338_v48  ;;  %2189 = vmatpush3.bf16.msra.mxu1 %v2338_v48 }
 0x204   : > { %2156 = vmatprep.subr.bf16.mxu0 %v2339_v55  ;;  %2182 = vmatprep.subr.bf16.mxu1 %v2339_v55  ;;  %v740_v13 = vpack.c.bf16 %v732_v37, %v731_v57 }
 0x206   : > { %2109 = vmatmul.mubr.bf16.gmra.mrb[12].mxu0 %v740_v13  ;;  %2141 = vmatmul.mubr.bf16.gmra.mrb[12].mxu1 %v740_v13 }
 0x207   : > { %2157 = vmatpush3.bf16.msra.mxu0 %v2339_v55  ;;  %2190 = vmatpush3.bf16.msra.mxu1 %v2339_v55 }
 0x208   : > { %2160 = vmatprep.mubr.bf16.mxu0 %v3119_v42  ;;  %2168 = vmatprep.mubr.bf16.mxu1 %v737_v34 }
 0x209   : > { %2158 = vmatprep.subr.bf16.mxu0 %v2340_v58  ;;  %2183 = vmatprep.subr.bf16.mxu1 %v2340_v58 }
 0x20b   : > { %2159 = vmatpush3.bf16.msra.mxu0 %v2340_v58  ;;  %2191 = vmatpush3.bf16.msra.mxu1 %v2340_v58 }
 0x20e   : > { %2161 = vmatmul.mubr.bf16.vlgmr.msra.gmra.mrb[16].mxu0 %v3130_v60  ;;  %2169 = vmatmul.mubr.bf16.vlgmr.msra.gmra.mrb[16].mxu1 %v738_v47 }
 0x20f   : > { %2164 = vmatprep.mubr.bf16.mxu0 %v3142_v17  ;;  %2172 = vmatprep.mubr.bf16.mxu1 %v739_v12 }
 0x216   : > { %2165 = vmatmul.mubr.bf16.gmra.mrb[20].mxu0 %v3152_v14  ;;  %2173 = vmatmul.mubr.bf16.gmra.mrb[20].mxu1 %v740_v13 }
 0x2c1   : > { %v2098_v10 = vpop.f32.mrb[0].mxu0  ;;  %v2130_v42 = vpop.f32.mrb[0].mxu1 }
 0x2c2   : > { %v846_v60 = vpop.f32.mrb[1].mxu0  ;;  %v1094_v61 = vpop.f32.mrb[1].mxu1  ;;  %v855_v2 = vadd.f32 %v2098_v10, %v3183_v26  ;;  %v1103_v3 = vadd.f32 %v2130_v42, %v3188_v59 }
 0x2c3   : > { %v2099_v62 = vpop.f32.mrb[2].mxu0  ;;  %v2131_v1 = vpop.f32.mrb[2].mxu1  ;;  %v847_v45 = vadd.f32 %v3183_v26, %v846_v60  ;;  %v1095_v9 = vadd.f32 %v3188_v59, %v1094_v61 }
 0x2c4   : > { %v858_v4 = vadd.f32 %v2099_v62, %v3183_v26  ;;  %v1106_v5 = vadd.f32 %v2131_v1, %v3188_v59  ;;  %v849_v38 = vpop.f32.mrb[3].mxu0  ;;  %v1097_v6 = vpop.f32.mrb[3].mxu1 }
 0x2c5   : > { %v850_v11 = vadd.f32 %v3183_v26, %v849_v38  ;;  %v1098_v16 = vadd.f32 %v3188_v59, %v1097_v6 }
 0x2c6   : > { %v1899_v17 = vpack.c.bf16 %v858_v4, %v855_v2  ;;  %v1939_v18 = vpack.c.bf16 %v1106_v5, %v1103_v3 }
 0x2c7   : > { %v1894_v19 = vpack.c.bf16 %v850_v11, %v847_v45  ;;  %v1934_v20 = vpack.c.bf16 %v1098_v16, %v1095_v9 }
 0x2c8   : > { %2011 = vst [vmem:[%s3202_s14 + $0x8] sm:$0xff] %v1899_v17   ;;  %2018 = vst [vmem:[%s3206_s16 + $0x8] sm:$0xff] %v1939_v18  }
 0x2c9   : > { %1895 = vst [vmem:[%s3202_s14] sm:$0xff] %v1894_v19   ;;  %1935 = vst [vmem:[%s3206_s16] sm:$0xff] %v1934_v20   ;;  %v2102_v46 = vpop.f32.mrb[4].mxu0  ;;  %v2134_v21 = vpop.f32.mrb[4].mxu1 }
 0x2ca   : > { %v862_v24 = vpop.f32.mrb[5].mxu0  ;;  %v1110_v36 = vpop.f32.mrb[5].mxu1  ;;  %v871_v25 = vadd.f32 %v2102_v46, %v3183_v26  ;;  %v1119_v14 = vadd.f32 %v2134_v21, %v3188_v59 }
 0x2cb   : > { %v2103_v53 = vpop.f32.mrb[6].mxu0  ;;  %v2135_v22 = vpop.f32.mrb[6].mxu1  ;;  %v863_v29 = vadd.f32 %v3183_v26, %v862_v24  ;;  %v1111_v54 = vadd.f32 %v3188_v59, %v1110_v36 }
 0x2cc   : > { %v874_v27 = vadd.f32 %v2103_v53, %v3183_v26  ;;  %v1122_v15 = vadd.f32 %v2135_v22, %v3188_v59  ;;  %v865_v28 = vpop.f32.mrb[7].mxu0  ;;  %v1113_v31 = vpop.f32.mrb[7].mxu1 }
 0x2cd   : > { %v866_v32 = vadd.f32 %v3183_v26, %v865_v28  ;;  %v1114_v63 = vadd.f32 %v3188_v59, %v1113_v31 }
 0x2ce   : > { %v1909_v33 = vpack.c.bf16 %v874_v27, %v871_v25  ;;  %v1949_v34 = vpack.c.bf16 %v1122_v15, %v1119_v14 }
 0x2cf   : > { %v1904_v35 = vpack.c.bf16 %v866_v32, %v863_v29  ;;  %v1944_v39 = vpack.c.bf16 %v1114_v63, %v1111_v54 }
 0x2d0   : > { %2013 = vst [vmem:[%s3202_s14 + $0x18] sm:$0xff] %v1909_v33   ;;  %2020 = vst [vmem:[%s3206_s16 + $0x18] sm:$0xff] %v1949_v34  }
 0x2d1   : > { %2012 = vst [vmem:[%s3202_s14 + $0x10] sm:$0xff] %v1904_v35   ;;  %2019 = vst [vmem:[%s3206_s16 + $0x10] sm:$0xff] %v1944_v39   ;;  %v2106_v40 = vpop.f32.mrb[8].mxu0  ;;  %v2138_v41 = vpop.f32.mrb[8].mxu1 }
 0x2d2   : > { %v878_v23 = vpop.f32.mrb[9].mxu0  ;;  %v1126_v0 = vpop.f32.mrb[9].mxu1  ;;  %v887_v7 = vadd.f32 %v2106_v40, %v3183_v26  ;;  %v1135_v47 = vadd.f32 %v2138_v41, %v3188_v59 }
 0x2d3   : > { %v2107_v43 = vpop.f32.mrb[10].mxu0  ;;  %v2139_v44 = vpop.f32.mrb[10].mxu1  ;;  %v879_v52 = vadd.f32 %v3183_v26, %v878_v23  ;;  %v1127_v30 = vadd.f32 %v3188_v59, %v1126_v0 }
 0x2d4   : > { %v890_v48 = vadd.f32 %v2107_v43, %v3183_v26  ;;  %v1138_v49 = vadd.f32 %v2139_v44, %v3188_v59  ;;  %v881_v50 = vpop.f32.mrb[11].mxu0  ;;  %v1129_v51 = vpop.f32.mrb[11].mxu1 }
 0x2d5   : > { %v882_v8 = vadd.f32 %v3183_v26, %v881_v50  ;;  %v1130_v12 = vadd.f32 %v3188_v59, %v1129_v51 }
 0x2d6   : > { %v1919_v55 = vpack.c.bf16 %v890_v48, %v887_v7  ;;  %v1959_v56 = vpack.c.bf16 %v1138_v49, %v1135_v47 }
 0x2d7   : > { %v1914_v57 = vpack.c.bf16 %v882_v8, %v879_v52  ;;  %v1954_v37 = vpack.c.bf16 %v1130_v12, %v1127_v30 }
 0x2d8   : > { %2015 = vst [vmem:[%s3202_s14 + $0x28] sm:$0xff] %v1919_v55   ;;  %2022 = vst [vmem:[%s3206_s16 + $0x28] sm:$0xff] %v1959_v56  }
 0x2d9   : > { %2014 = vst [vmem:[%s3202_s14 + $0x20] sm:$0xff] %v1914_v57   ;;  %2021 = vst [vmem:[%s3206_s16 + $0x20] sm:$0xff] %v1954_v37   ;;  %v2110_v13 = vpop.f32.mrb[12].mxu0  ;;  %v2142_v58 = vpop.f32.mrb[12].mxu1 }
 0x2da   : > { %v894_v10 = vpop.f32.mrb[13].mxu0  ;;  %v1142_v42 = vpop.f32.mrb[13].mxu1  ;;  %v903_v62 = vadd.f32 %v2110_v13, %v3183_v26  ;;  %v1151_v1 = vadd.f32 %v2142_v58, %v3188_v59 }
 0x2db   : > { %v2111_v60 = vpop.f32.mrb[14].mxu0  ;;  %v2143_v61 = vpop.f32.mrb[14].mxu1  ;;  %v895_v38 = vadd.f32 %v3183_v26, %v894_v10  ;;  %v1143_v6 = vadd.f32 %v3188_v59, %v1142_v42 }
 0x2dc   : > { %v906_v2 = vadd.f32 %v2111_v60, %v3183_v26  ;;  %v1154_v3 = vadd.f32 %v2143_v61, %v3188_v59  ;;  %v897_v4 = vpop.f32.mrb[15].mxu0  ;;  %v1145_v5 = vpop.f32.mrb[15].mxu1 }
 0x2dd   : > { %v898_v45 = vadd.f32 %v3183_v26, %v897_v4  ;;  %v1146_v9 = vadd.f32 %v3188_v59, %v1145_v5  ;;  %v3275_v59 = vld [vmem:[%s3487_s13] ss:$0 sm:$0xff] }
 0x2de   : > { %v1929_v11 = vpack.c.bf16 %v906_v2, %v903_v62  ;;  %v1969_v16 = vpack.c.bf16 %v1154_v3, %v1151_v1 }
 0x2df   : > { %v1924_v17 = vpack.c.bf16 %v898_v45, %v895_v38  ;;  %v1964_v18 = vpack.c.bf16 %v1146_v9, %v1143_v6 }
 0x2e0   : > { %2017 = vst [vmem:[%s3202_s14 + $0x38] sm:$0xff] %v1929_v11   ;;  %2024 = vst [vmem:[%s3206_s16 + $0x38] sm:$0xff] %v1969_v16  }
 0x2e1   : > { %2016 = vst [vmem:[%s3202_s14 + $0x30] sm:$0xff] %v1924_v17   ;;  %2023 = vst [vmem:[%s3206_s16 + $0x30] sm:$0xff] %v1964_v18   ;;  %v3270_v26 = vpop.f32.mrb[16].mxu0  ;;  %v2170_v19 = vpop.f32.mrb[16].mxu1  ;;  %s2663_s14 = smov [#allocation11]  }
 0x2e2   : > { %v3277_v20 = vpop.f32.mrb[17].mxu0  ;;  %v3279_v46 = vpop.f32.mrb[17].mxu1  ;;  %s2491_s16 = sshll.u32 %s2663_s14, 4  ;;  %s2492_s16 = int_to_ptr.vmem [resolvable:$false] %s2491_s16 }
 0x2e3   : > { %s2493_s28 = scalar_lea.vmem %s2492_s16, 2048  ;;  %p2494_p1 = scmp.lt.s32.totalorder %s3248_s27, %s2492_s16 }
 0x2e4   : > { %p2495_p4 = scmp.lt.s32.totalorder %s2493_s28, %s2487_s20 }
 0x2e6   : > { %p2496_p8 = por %p2495_p4, %p2494_p1 }
 0x2e8   : > { %p2497_p12 = pnand %p2496_p8, %p2490_p11 }
 0x2ea   : > { %2500 = shalt.err (!%p2497_p12)
}
 0x2eb   : > { %s2501_s29 = scalar_lea.hbm %s3258_s3, 1024  ;;  %s2505_s5 = scalar_lea.hbm %s3485_s10, 4096 }
 0x2ec   : > { %p2502_p13 = scmp.ne.s32.totalorder %s3258_s3, %s2501_s29  ;;  %p2506_p6 = scmp.lt.u32.totalorder %s3258_s3, %s3485_s10 }
 0x2ed   : > { %p2507_p0 = scmp.lt.u32.totalorder %s2505_s5, %s2501_s29  ;;  %p2509_p5 = scmp.lt.u32.totalorder %s2501_s29, %s3258_s3 }
 0x2ee   : > { %p2503_p2 = pnand %p2502_p13, %p2901_p3 }
 0x2ef   : > { %p2508_p10 = por %p2507_p0, %p2506_p6 }
 0x2f0   : > { %p2504_p9 = pneg %p2503_p2 }
 0x2f1   : > { %p2510_p7 = por %p2509_p5, %p2508_p10 }
 0x2f3   : > { %p2511_p11 = pnand %p2510_p7, %p2504_p9 }
 0x2f5   : > { %2514 = shalt.err (!%p2511_p11)
}
 0x2f6   : > { %s2664_s20 = smov 64   ;;  %s2665_s16 = smov 4   ;;  %v2163_v21 = vpop.f32.mrb[18].mxu0  ;;  %v2171_v24 = vpop.f32.mrb[18].mxu1 }
 0x2f7   : > { %2207 = dma.vmem_to_hbm [thread:$0]  (%p2901_p3), %s3248_s27, 1024, %s3258_s3, %s3281_s25, %s2664_s20, %s2664_s20, %s2665_s16  }
 0x2f8   : > { %s1486_s28 = scalar_lea.sflag [#allocation4], %s2966_s17  ;;  %s2515_s29 = scalar_lea.vmem %s3246_s4, 1024 }
 0x2f9   : > { %p2516_p1 = scmp.ne.s32.totalorder %s3246_s4, %s2515_s29  ;;  %s2666_s11 = smov [#allocation10]  }
 0x2fa   : > { %s2519_s26 = sshll.u32 %s2666_s11, 4  ;;  %s2520_s26 = int_to_ptr.vmem [resolvable:$false] %s2519_s26 }
 0x2fb   : > { %p2517_p4 = pnand %p2516_p1, %p2901_p3  ;;  %s2521_s5 = scalar_lea.vmem %s2520_s26, 2048 }
 0x2fc   : > { %p2522_p12 = scmp.lt.s32.totalorder %s3246_s4, %s2520_s26  ;;  %p2523_p13 = scmp.lt.s32.totalorder %s2521_s5, %s2515_s29 }
 0x2fd   : > { %p2518_p8 = pneg %p2517_p4 }
 0x2fe   : > { %p2524_p2 = por %p2523_p13, %p2522_p12 }
 0x300   : > { %p2525_p9 = pnand %p2524_p2, %p2518_p8 }
 0x302   : > { %2528 = shalt.err (!%p2525_p9)
}
 0x303   : > { %s2529_s27 = scalar_lea.hbm %s3266_s7, 1024  ;;  %s2533_s14 = scalar_lea.hbm %s3486_s8, 4096 }
 0x304   : > { %p2530_p6 = scmp.ne.s32.totalorder %s3266_s7, %s2529_s27  ;;  %p2534_p5 = scmp.lt.u32.totalorder %s3266_s7, %s3486_s8 }
 0x305   : > { %p2535_p7 = scmp.lt.u32.totalorder %s2533_s14, %s2529_s27  ;;  %p2537_p1 = scmp.lt.u32.totalorder %s2529_s27, %s3266_s7 }
 0x306   : > { %p2531_p0 = pnand %p2530_p6, %p2901_p3 }
 0x307   : > { %p2536_p11 = por %p2535_p7, %p2534_p5 }
 0x308   : > { %p2532_p10 = pneg %p2531_p0 }
 0x309   : > { %p2538_p4 = por %p2537_p1, %p2536_p11 }
 0x30b   : > { %p2539_p8 = pnand %p2538_p4, %p2532_p10 }
 0x30d   : > { %2542 = shalt.err (!%p2539_p8)
}
 0x30e   : > { %2206 = dma.vmem_to_hbm [thread:$0]  (%p2901_p3), %s3246_s4, 1024, %s3266_s7, %s1486_s28, %s2664_s20, %s2664_s20, %s2665_s16   ;;  %v1351_v36 = vadd.f32 %v3270_v26, %v3275_v59  ;;  %v1383_v53 = vadd.f32 %v2170_v19, %v3275_v59  ;;  %v1354_v22 = vadd.f32 %v2163_v21, %v3275_v59  ;;  %v1386_v25 = vadd.f32 %v2171_v24, %v3275_v59  ;;  %v1345_v14 = vpop.f32.mrb[19].mxu0  ;;  %v1377_v27 = vpop.f32.mrb[19].mxu1 }
 0x30f   : > { %v1343_v15 = vadd.f32 %v3275_v59, %v3277_v20  ;;  %v1375_v28 = vadd.f32 %v3275_v59, %v3279_v46  ;;  %v1346_v31 = vadd.f32 %v3275_v59, %v1345_v14  ;;  %v1378_v29 = vadd.f32 %v3275_v59, %v1377_v27  ;;  %s3347_s17 = scalar_lea.vmem [#allocation13], %s3191_s30  ;;  %v2166_v34 = vpop.f32.mrb[20].mxu0  ;;  %v2174_v35 = vpop.f32.mrb[20].mxu1  ;;  %s3488_s28 = sld [smem:[#allocation31_spill]] }
 0x310   : > { %v1979_v54 = vpack.c.bf16 %v1354_v22, %v1351_v36  ;;  %v1999_v32 = vpack.c.bf16 %v1386_v25, %v1383_v53  ;;  %v1358_v39 = vpop.f32.mrb[21].mxu0  ;;  %v1390_v40 = vpop.f32.mrb[21].mxu1  ;;  %s1547_s4 = sshll.u32 %s3347_s17, 4  ;;  %v1367_v0 = vadd.f32 %v2166_v34, %v3275_v59  ;;  %v1399_v43 = vadd.f32 %v2174_v35, %v3275_v59  ;;  %s2667_s27 = smov [#allocation13]   ;;  %s3362_s4 = int_to_ptr.vmem [resolvable:$true] %s1547_s4 }
 0x311   : > { %v1974_v63 = vpack.c.bf16 %v1346_v31, %v1343_v15  ;;  %v1994_v33 = vpack.c.bf16 %v1378_v29, %v1375_v28  ;;  %v2167_v41 = vpop.f32.mrb[22].mxu0  ;;  %v2175_v23 = vpop.f32.mrb[22].mxu1  ;;  %v1359_v49 = vadd.f32 %v3275_v59, %v1358_v39  ;;  %v1391_v50 = vadd.f32 %v3275_v59, %v1390_v40  ;;  %s2543_s5 = scalar_lea.vmem %s3362_s4, 1024  ;;  %s2547_s3 = sshll.u32 %s2667_s27, 4  ;;  %s2548_s3 = int_to_ptr.vmem [resolvable:$false] %s2547_s3 }
 0x312   : > { %2025 = vst [vmem:[%s3347_s17 + $0x8] sm:$0xff] %v1979_v54   ;;  %2029 = vst [vmem:[%s3347_s17 + $0x28] sm:$0xff] %v1999_v32   ;;  %v1370_v44 = vadd.f32 %v2167_v41, %v3275_v59  ;;  %v1402_v7 = vadd.f32 %v2175_v23, %v3275_v59  ;;  %v1361_v47 = vpop.f32.mrb[23].mxu0  ;;  %v1393_v48 = vpop.f32.mrb[23].mxu1  ;;  %p2544_p12 = scmp.ne.s32.totalorder %s3362_s4, %s2543_s5  ;;  %s2549_s13 = scalar_lea.vmem %s2548_s3, 2048 }
 0x313   : > { %1975 = vst [vmem:[%s3347_s17] sm:$0xff] %v1974_v63   ;;  %2028 = vst [vmem:[%s3347_s17 + $0x20] sm:$0xff] %v1994_v33   ;;  %v1362_v51 = vadd.f32 %v3275_v59, %v1361_v47  ;;  %v1394_v52 = vadd.f32 %v3275_v59, %v1393_v48  ;;  %p2550_p9 = scmp.lt.s32.totalorder %s3362_s4, %s2548_s3  ;;  %p2551_p6 = scmp.lt.s32.totalorder %s2549_s13, %s2543_s5 }
 0x314   : > { %v1989_v30 = vpack.c.bf16 %v1370_v44, %v1367_v0  ;;  %v2009_v8 = vpack.c.bf16 %v1402_v7, %v1399_v43  ;;  %p2545_p13 = pnand %p2544_p12, %p2901_p3 }
 0x315   : > { %v1984_v12 = vpack.c.bf16 %v1362_v51, %v1359_v49  ;;  %v2004_v55 = vpack.c.bf16 %v1394_v52, %v1391_v50  ;;  %s3368_s29 = scalar_lea.hbm %s3488_s28, %s3244_s12  ;;  %p2552_p0 = por %p2551_p6, %p2550_p9 }
 0x316   : > { %2027 = vst [vmem:[%s3347_s17 + $0x18] sm:$0xff] %v1989_v30   ;;  %2031 = vst [vmem:[%s3347_s17 + $0x38] sm:$0xff] %v2009_v8   ;;  %p2546_p2 = pneg %p2545_p13 }
 0x317   : > { %2026 = vst [vmem:[%s3347_s17 + $0x10] sm:$0xff] %v1984_v12   ;;  %2030 = vst [vmem:[%s3347_s17 + $0x30] sm:$0xff] %v2004_v55  }
 0x318   : > { %p2553_p10 = pnand %p2552_p0, %p2546_p2 }
 0x31a   : > { %2556 = shalt.err (!%p2553_p10)
}
 0x31b   : > { %s2557_s12 = scalar_lea.hbm %s3368_s29, 1024  ;;  %s2561_s26 = scalar_lea.hbm %s3488_s28, 4096 }
 0x31c   : > { %p2558_p5 = scmp.ne.s32.totalorder %s3368_s29, %s2557_s12  ;;  %p2562_p1 = scmp.lt.u32.totalorder %s3368_s29, %s3488_s28 }
 0x31d   : > { %p2563_p4 = scmp.lt.u32.totalorder %s2561_s26, %s2557_s12  ;;  %p2565_p12 = scmp.lt.u32.totalorder %s2557_s12, %s3368_s29 }
 0x31e   : > { %p2559_p7 = pnand %p2558_p5, %p2901_p3 }
 0x31f   : > { %p2564_p8 = por %p2563_p4, %p2562_p1 }
 0x320   : > { %p2560_p11 = pneg %p2559_p7 }
 0x321   : > { %p2566_p13 = por %p2565_p12, %p2564_p8 }
 0x323   : > { %p2567_p2 = pnand %p2566_p13, %p2560_p11 }
 0x325   : > { %2570 = shalt.err (!%p2567_p2)
}
 0x326   : > { %2208 = dma.vmem_to_hbm [thread:$0]  (%p2901_p3), %s3362_s4, 1024, %s3368_s29, %s3281_s25, %s2664_s20, %s2664_s20, %s2665_s16  }
 0x327 PF: > { %s3489_s7 = sld [smem:[#allocation19_spill]]  ;;  %s3490_s5 = sld [smem:[#allocation22_spill]] }
 0x328   : > { %p2243_p9 = scmp.ge.s32.totalorder %s2653_s24, 2 }
 0x32d   : > { %s1562_s27 = sand.u32 1, %s3489_s7   ;;  %p3491_p6 = scmp.ne.s32.totalorder %s3490_s5, 0 }
 0x32e   : > { %s1563_s3 = scalar_lea.sflag [#allocation4], %s1562_s27 }
 0x32f   : > { %p2227_p0 = pnand %p2243_p9, %p3491_p6 }
 0x331   : > { %2616 = dma.done.wait (!%p2227_p0), %s1563_s3, 1024  }
 0x332   : > { %2618 = vsyncadd (!%p2227_p0), %s1563_s3, 4294966272  ;;  %s3492_s21 = sadd.s32 4294967294, %s2653_s24  }
 0x333   : > { %s1571_s13 = sand.u32 1, %s3492_s21  }
 0x334   : > { %s1572_s12 = scalar_lea.sflag [#allocation12], %s1571_s13 }
 0x335   : > { %2620 = dma.done.wait (!%p2227_p0), %s1572_s12, 2048  }
 0x336   : > { %2622 = vsyncadd (!%p2227_p0), %s1572_s12, 4294965248  ;;  %s33_s24 = sadd.s32 1, %s2653_s24   ;;  %s3493_s25 = sld [smem:[#allocation23_spill]] }
 0x337   : > { %p30_p3 = scmp.ge.s32.totalorder %s33_s24, 6   ;;  %s3494_s17 = smov %s2629_s18 }
 0x338   : > { %s3495_s18 = smov %s2633_s19  ;;  %s3496_s19 = smov %s2918_s15 }
 0x339   : > { %s3497_s20 = smov %s2645_s22  ;;  %s3498_s21 = smov %s2649_s23 }
 0x33a   : > { %s3499_s22 = smov %s3502_s9  ;;  %32 = sbr.rel (!%p30_p3) target bundleno = 20 (0x14), region = 145 }
 0x33c   : > { %s3500_s23 = smov %s3493_s25 }
 0x341   :  { %1586 = vsyncpa [#allocation3], 1 }
 0x342   :  { %1588 = vsyncpa [#allocation3 + $0x1], 1 }
 0x343   :  { %1589 = vsyncpa [#allocation6], 1 }
 0x344   :  { %1590 = vsyncpa [#allocation9], 1 }
 0x345   :  { %1591 = vsyncpa [#allocation4], 1 }
 0x346   :  { %1593 = vsyncpa [#allocation4 + $0x1], 1 }
 0x347   :  { %1594 = vsyncpa [#allocation12], 1 }
 0x348   :  { %1596 = vsyncpa [#allocation12 + $0x1], 1 }

</bundles_post_ra>
